<compile_context>
chip_gen: v5e
topology: v5e:2x2
jax: 0.10.0
libtpu: 0.0.40
codegen_flags: <defaults>
</compile_context>

<pallas_src>
import functools

import jax
import jax.numpy as jnp
from jax.experimental import pallas as pl
from jax.experimental.pallas import tpu as pltpu

LN_EPS = 1e-5  # PyTorch nn.LayerNorm default eps


# ----------------------------- in-kernel helpers -----------------------------
def _layernorm(x, gamma, beta):
    # PyTorch LayerNorm: biased variance, eps inside sqrt.
    mu = jnp.mean(x, axis=-1, keepdims=True)
    var = jnp.mean((x - mu) ** 2, axis=-1, keepdims=True)
    return (x - mu) * jax.lax.rsqrt(var + LN_EPS) * gamma + beta


def _erf(z):
    # Abramowitz & Stegun 7.1.26 (|err| < 1.5e-7): exp-only, lowers cleanly.
    a1, a2, a3, a4, a5 = 0.254829592, -0.284496736, 1.421413741, -1.453152027, 1.061405429
    p = 0.3275911
    sgn = jnp.where(z >= 0, 1.0, -1.0).astype(z.dtype)
    az = jnp.abs(z)
    t = 1.0 / (1.0 + p * az)
    poly = ((((a5 * t + a4) * t + a3) * t + a2) * t + a1) * t
    return sgn * (1.0 - poly * jnp.exp(-az * az))


def _gelu_exact(x):
    # nn.GELU() default is the exact (erf-based) GELU.
    return 0.5 * x * (1.0 + _erf(x * 0.7071067811865476))


# ----------------------- fused AggViT forward kernel -----------------------
# Block-diagonal multi-head attention layout used below (H=hidden, d=H/heads):
#   Kexp[h*n + j, c] = K[j, c] if c//d == h else 0        (heads*n, H)
#   dots[i, h*n + j] = sum_c Q[i, c] * Kexp[h*n+j, c] = Q_h K_h^T   (n, heads*n)
#   out = attn @ Vexp reproduces torch's `rearrange(..., 'h n d -> n (h d)')`.
# The row replication K -> [K; K; ...] is done with an MXU matmul against a
# constant one-hot matrix T (heads*n, n), avoiding unaligned sublane concats.
def _aggvit_fused_kernel(x_ref, pe_ref, km_ref, trep_ref, bd_ref, seg_ref,
                         nfg_ref, nfb_ref, wp_ref, bp_ref,
                         ln1g_ref, ln1b_ref, wq_ref, wk_ref, wv_ref,
                         wo_ref, bo_ref, ln2g_ref, ln2b_ref,
                         w1_ref, b1_ref, w2_ref, b2_ref,
                         out_ref, attn_ref, dots_ref,
                         *, chunk, n, heads):
    f32, bf16 = jnp.float32, jnp.bfloat16
    neg = jnp.float32(-1e30)

    x = x_ref[0]                                   # (chunk*n, in_dim) f32
    pe = pe_ref[0]                                 # (chunk*n, hidden) f32

    # ---- LayerNorm(in_dim) + 1x1-conv projection + positional embedding ----
    xn = _layernorm(x, nfg_ref[...], nfb_ref[...])
    tok = (jnp.dot(xn.astype(bf16), wp_ref[...], preferred_element_type=f32)
           + bp_ref[...] + pe)                     # (chunk*n, hidden)

    # ---- attention (pre-norm); 1/sqrt(d) already folded into wq ----
    t1 = _layernorm(tok, ln1g_ref[...], ln1b_ref[...]).astype(bf16)
    q_all = jnp.dot(t1, wq_ref[...], preferred_element_type=f32)   # (chunk*n, H)
    k_all = jnp.dot(t1, wk_ref[...], preferred_element_type=f32)
    v_all = jnp.dot(t1, wv_ref[...], preferred_element_type=f32)

    trep = trep_ref[...]        # (heads*n, n)      bf16 one-hot row replicator
    bd = bd_ref[...]            # (heads*n, hidden) f32  block-diagonal 0/1 mask
    seg = seg_ref[...]          # (heads*n, heads*n) bf16 same-head 0/1 matrix

    o_rows = []
    for cb in range(chunk):     # static unrolled loop over batch elements
        r0, r1 = cb * n, (cb + 1) * n
        q_b = q_all[r0:r1, :].astype(bf16)                       # (n, H)
        k_b = k_all[r0:r1, :].astype(bf16)
        v_b = v_all[r0:r1, :].astype(bf16)

        # replicate rows across heads on the MXU, then block-diag mask on VPU
        k_exp = (jnp.dot(trep, k_b, preferred_element_type=f32) * bd).astype(bf16)
        v_exp = (jnp.dot(trep, v_b, preferred_element_type=f32) * bd).astype(bf16)

        # all-head scores in one lane-dense (n, heads*n) contraction
        d_b = jax.lax.dot_general(q_b, k_exp, (((1,), (1,)), ((), ())),
                                  preferred_element_type=f32)
        d_b = jnp.where(km_ref[0, cb, :, :] > 0, neg, d_b)   # mask zero-pad keys
        dots_ref[0, cb, :, :] = d_b

        # per-head softmax: a global row-max is a valid (and stable) shift since
        # it cancels in the ratio; the per-head sums come from one MXU matmul.
        # (cls key is never masked, so every head group has >=1 live key.)
        m = jnp.max(d_b, axis=-1, keepdims=True)
        e = jnp.exp(d_b - m)                               # masked entries -> 0
        den = jnp.dot(e.astype(bf16), seg, preferred_element_type=f32)
        a = e * pl.reciprocal(den, approx=True)
        attn_ref[0, cb, :, :] = a

        o_rows.append(jnp.dot(a.astype(bf16), v_exp, preferred_element_type=f32))

    o = jnp.concatenate(o_rows, axis=0)                    # (chunk*n, hidden)
    o = jnp.dot(o.astype(bf16), wo_ref[...], preferred_element_type=f32) + bo_ref[...]
    res1 = tok + o                                         # residual

    # ---- feed-forward (pre-norm) ----
    t2 = _layernorm(res1, ln2g_ref[...], ln2b_ref[...]).astype(bf16)
    h = jnp.dot(t2, w1_ref[...], preferred_element_type=f32) + b1_ref[...]
    h = _gelu_exact(h)
    ff = jnp.dot(h.astype(bf16), w2_ref[...], preferred_element_type=f32) + b2_ref[...]
    out_ref[0] = res1 + ff


# ------------------------------- forward glue -------------------------------
def agg_vit_forward(params, x, pos, heads, avg_pool=False, batch_chunk=None):
    b, p, in_dim = x.shape
    hidden = params['proj_w'].shape[1]
    mlp = params['w_ff1'].shape[1]
    n = p + 1
    d = hidden // heads
    hn = heads * n
    if batch_chunk is None:
        batch_chunk = b                      # whole batch in one grid step here
    assert b % batch_chunk == 0
    nc = b // batch_chunk

    # zeros = x.std(-1) == 0   (unbiased std, like torch)
    zeros = jnp.std(x, axis=-1, ddof=1) == 0             # (b, p) bool
    masks = jnp.zeros((b, p), x.dtype)                   # args.prob_mask == 0
    masked_x = x                                         # no mask-token fill

    cls = jnp.broadcast_to(params['cls_token'], (b, 1, in_dim))
    x_cat = jnp.concatenate([cls, masked_x], axis=1)     # (b, n, in_dim)

    # positional embedding gather (glue), added inside the fused kernel
    pos_full = jnp.concatenate([jnp.zeros((b, 1, 2), pos.dtype), pos + 1], axis=1)
    pe_x = params['pos_embedding_x'][0][pos_full[:, :, 0]]
    pe_y = params['pos_embedding_y'][0][pos_full[:, :, 1]]
    pos_emb = jnp.concatenate([pe_x, pe_y], axis=-1)     # (b, n, hidden)

    # key zero-mask, pre-tiled across heads so lane index h*n+j carries key j
    key_zero = jnp.concatenate(
        [jnp.zeros((b, 1), jnp.float32), zeros.astype(jnp.float32)], axis=1)
    key_zero_t = jnp.tile(key_zero, (1, heads))          # (b, heads*n)

    # structural constants for the fused multi-head attention
    rh = jnp.arange(hn, dtype=jnp.int32) // n            # head id of each row
    trep = (jnp.arange(hn, dtype=jnp.int32)[:, None] % n ==
            jnp.arange(n, dtype=jnp.int32)[None, :]).astype(jnp.bfloat16)
    bd_mask = (rh[:, None] ==
               (jnp.arange(hidden, dtype=jnp.int32) // d)[None, :]).astype(jnp.float32)
    seg_mat = (rh[:, None] == rh[None, :]).astype(jnp.bfloat16)

    # weight prep: bf16 casts once, 1/sqrt(d) folded into the Q columns
    scale = float(d) ** -0.5
    wq = (params['w_qkv'][:, :hidden] * scale).astype(jnp.bfloat16)
    wk = params['w_qkv'][:, hidden:2 * hidden].astype(jnp.bfloat16)
    wv = params['w_qkv'][:, 2 * hidden:].astype(jnp.bfloat16)
    bf = lambda w: w.astype(jnp.bfloat16)
    row = lambda v: v.reshape(1, -1)

    cn = batch_chunk * n
    x3 = x_cat.reshape(nc, cn, in_dim)
    pe3 = pos_emb.reshape(nc, cn, hidden)
    km3 = key_zero_t.reshape(nc, batch_chunk, 1, hn)

    kernel = functools.partial(_aggvit_fused_kernel,
                               chunk=batch_chunk, n=n, heads=heads)
    rep = lambda shape: pl.BlockSpec(shape, lambda i: (0,) * len(shape))

    out3, attn3, dots3 = pl.pallas_call(
        kernel,
        out_shape=(
            jax.ShapeDtypeStruct((nc, cn, hidden), jnp.float32),
            jax.ShapeDtypeStruct((nc, batch_chunk, n, hn), jnp.float32),
            jax.ShapeDtypeStruct((nc, batch_chunk, n, hn), jnp.float32),
        ),
        grid=(nc,),
        in_specs=[
            pl.BlockSpec((1, cn, in_dim), lambda i: (i, 0, 0)),
            pl.BlockSpec((1, cn, hidden), lambda i: (i, 0, 0)),
            pl.BlockSpec((1, batch_chunk, 1, hn), lambda i: (i, 0, 0, 0)),
            rep((hn, n)), rep((hn, hidden)), rep((hn, hn)),
            rep((1, in_dim)), rep((1, in_dim)),
            rep((in_dim, hidden)), rep((1, hidden)),
            rep((1, hidden)), rep((1, hidden)),
            rep((hidden, hidden)), rep((hidden, hidden)), rep((hidden, hidden)),
            rep((hidden, hidden)), rep((1, hidden)),
            rep((1, hidden)), rep((1, hidden)),
            rep((hidden, mlp)), rep((1, mlp)),
            rep((mlp, hidden)), rep((1, hidden)),
        ],
        out_specs=(
            pl.BlockSpec((1, cn, hidden), lambda i: (i, 0, 0)),
            pl.BlockSpec((1, batch_chunk, n, hn), lambda i: (i, 0, 0, 0)),
            pl.BlockSpec((1, batch_chunk, n, hn), lambda i: (i, 0, 0, 0)),
        ),
        compiler_params=pltpu.CompilerParams(dimension_semantics=("parallel",)),
    )(x3, pe3, km3, trep, bd_mask, seg_mat,
      row(params['norm_feat_g']), row(params['norm_feat_b']),
      bf(params['proj_w']), row(params['proj_b']),
      row(params['ln1_g']), row(params['ln1_b']),
      wq, wk, wv,
      bf(params['w_out']), row(params['b_out']),
      row(params['ln2_g']), row(params['ln2_b']),
      bf(params['w_ff1']), row(params['b_ff1']),
      bf(params['w_ff2']), row(params['b_ff2']))

    out_x = out3.reshape(b, n, hidden)
    # lane-dense kernel layout -> module layout (tiny XLA transpose outside)
    attn = attn3.reshape(b, n, heads, n).transpose(0, 2, 1, 3)
    dots = dots3.reshape(b, n, heads, n).transpose(0, 2, 1, 3)

    enc_seq = out_x[:, 1:, :].reshape(b * p, hidden)
    org_seq = x.reshape(b * p, in_dim)                   # self.proj is Identity
    enc_cls = out_x[:, 0, :]                             # avg_pool=False path
    # TODO(synk): avg_pool=True masked_average pooling path not implemented.
    return {'enc_cls': enc_cls, 'enc_seq': enc_seq, 'org_seq': org_seq,
            'pos': pos_full, 'masks': masks.reshape(-1),
            'zeros': zeros.reshape(-1), 'attn': attn, 'dots': dots}


# --------------------------- pure-JAX reference check ---------------------------
def _ref_forward(params, x, pos, heads):
    b, p, in_dim = x.shape
    hidden = params['proj_w'].shape[1]
    n = p + 1
    zeros = jnp.std(x, axis=-1, ddof=1) == 0
    cls = jnp.broadcast_to(params['cls_token'], (b, 1, in_dim))
    x_cat = jnp.concatenate([cls, x], axis=1)
    pos_full = jnp.concatenate([jnp.zeros((b, 1, 2), pos.dtype), pos + 1], axis=1)
    pe = jnp.concatenate([params['pos_embedding_x'][0][pos_full[:, :, 0]],
                          params['pos_embedding_y'][0][pos_full[:, :, 1]]], axis=-1)
    xn = _layernorm(x_cat, params['norm_feat_g'], params['norm_feat_b'])
    tok = jnp.einsum('bnd,dh->bnh', xn, params['proj_w']) + params['proj_b'] + pe
    key_zero = jnp.concatenate([jnp.zeros((b, 1)), zeros.astype(jnp.float32)], axis=1)

    d = hidden // heads
    scale = float(d) ** -0.5
    x1 = _layernorm(tok, params['ln1_g'], params['ln1_b'])
    qkv = jnp.einsum('bnh,hk->bnk', x1, params['w_qkv'])
    q, k_, v = jnp.split(qkv, 3, axis=-1)
    sh = lambda t: t.reshape(b, n, heads, d).transpose(0, 2, 1, 3)
    q, k_, v = sh(q), sh(k_), sh(v)
    dots = jnp.einsum('bhqd,bhkd->bhqk', q, k_) * scale
    dots = jnp.where(key_zero[:, None, None, :] > 0, -1e30, dots)
    attn = jax.nn.softmax(dots, axis=-1)
    o = jnp.einsum('bhqk,bhkd->bhqd', attn, v).transpose(0, 2, 1, 3).reshape(b, n, hidden)
    tok2 = tok + (o @ params['w_out'] + params['b_out'])
    x2 = _layernorm(tok2, params['ln2_g'], params['ln2_b'])
    ff = _gelu_exact(x2 @ params['w_ff1'] + params['b_ff1']) @ params['w_ff2'] + params['b_ff2']
    out = tok2 + ff
    return {'enc_cls': out[:, 0, :],
            'enc_seq': out[:, 1:, :].reshape(b * p, hidden),
            'attn': attn}


# ------------------------------------ main ------------------------------------
if __name__ == "__main__":
    B, P, IN_DIM = 2, 8, 16
    HIDDEN, MLP, HEADS = 32, 64, 8

    keys = iter(jax.random.split(jax.random.PRNGKey(0), 24))
    nrm = lambda shape, s=1.0: s * jax.random.normal(next(keys), shape, jnp.float32)

    params = {
        'cls_token': nrm((1, 1, IN_DIM)),
        'mask_token': nrm((IN_DIM,)),            # unused: args.prob_mask == 0
        'pos_embedding_x': nrm((1, 512, HIDDEN // 2)),
        'pos_embedding_y': nrm((1, 512, HIDDEN // 2)),
        'norm_feat_g': jnp.ones((IN_DIM,), jnp.float32),
        'norm_feat_b': jnp.zeros((IN_DIM,), jnp.float32),
        'proj_w': nrm((IN_DIM, HIDDEN), 0.1),     # 1x1 conv weight (transposed)
        'proj_b': nrm((HIDDEN,), 0.1),
        'ln1_g': jnp.ones((HIDDEN,), jnp.float32),
        'ln1_b': jnp.zeros((HIDDEN,), jnp.float32),
        'w_qkv': nrm((HIDDEN, 3 * HIDDEN), 0.05),
        'w_out': nrm((HIDDEN, HIDDEN), 0.05),
        'b_out': jnp.zeros((HIDDEN,), jnp.float32),
        'ln2_g': jnp.ones((HIDDEN,), jnp.float32),
        'ln2_b': jnp.zeros((HIDDEN,), jnp.float32),
        'w_ff1': nrm((HIDDEN, MLP), 0.05),
        'b_ff1': jnp.zeros((MLP,), jnp.float32),
        'w_ff2': nrm((MLP, HIDDEN), 0.05),
        'b_ff2': jnp.zeros((HIDDEN,), jnp.float32),
    }

    x = jax.random.normal(next(keys), (B, P, IN_DIM), jnp.float32)
    x = x.at[0, 3, :].set(0.0)   # one zero-padded patch -> exercises zero_mask
    pos = jax.random.randint(next(keys), (B, P, 2), 0, 10, dtype=jnp.int32)

    out = agg_vit_forward(params, x, pos, heads=HEADS)
    jax.block_until_ready(out)

    assert out['enc_cls'].shape == (B, HIDDEN)
    assert out['enc_seq'].shape == (B * P, HIDDEN)
    assert out['org_seq'].shape == (B * P, IN_DIM)
    assert out['attn'].shape == (B, HEADS, P + 1, P + 1)
    assert out['dots'].shape == (B, HEADS, P + 1, P + 1)

    ref = _ref_forward(params, x, pos, heads=HEADS)
    for name in ('enc_cls', 'enc_seq', 'attn'):
        assert jnp.allclose(out[name], ref[name], atol=5e-2, rtol=5e-2), name

    print("KERNEL_OK")
</pallas_src>

<mosaic_0001>
module attributes {stable_mosaic.version = 11 : i64} {
  func.func @_aggvit_fused_kernel(%arg0: i32, %arg1: memref<1x18x16xf32, #tpu.memory_space<vmem>>, %arg2: memref<1x18x32xf32, #tpu.memory_space<vmem>>, %arg3: memref<1x2x1x72xf32, #tpu.memory_space<vmem>>, %arg4: memref<72x9xbf16, #tpu.memory_space<vmem>>, %arg5: memref<72x32xf32, #tpu.memory_space<vmem>>, %arg6: memref<72x72xbf16, #tpu.memory_space<vmem>>, %arg7: memref<1x16xf32, #tpu.memory_space<vmem>>, %arg8: memref<1x16xf32, #tpu.memory_space<vmem>>, %arg9: memref<16x32xbf16, #tpu.memory_space<vmem>>, %arg10: memref<1x32xf32, #tpu.memory_space<vmem>>, %arg11: memref<1x32xf32, #tpu.memory_space<vmem>>, %arg12: memref<1x32xf32, #tpu.memory_space<vmem>>, %arg13: memref<32x32xbf16, #tpu.memory_space<vmem>>, %arg14: memref<32x32xbf16, #tpu.memory_space<vmem>>, %arg15: memref<32x32xbf16, #tpu.memory_space<vmem>>, %arg16: memref<32x32xbf16, #tpu.memory_space<vmem>>, %arg17: memref<1x32xf32, #tpu.memory_space<vmem>>, %arg18: memref<1x32xf32, #tpu.memory_space<vmem>>, %arg19: memref<1x32xf32, #tpu.memory_space<vmem>>, %arg20: memref<32x64xbf16, #tpu.memory_space<vmem>>, %arg21: memref<1x64xf32, #tpu.memory_space<vmem>>, %arg22: memref<64x32xbf16, #tpu.memory_space<vmem>>, %arg23: memref<1x32xf32, #tpu.memory_space<vmem>>, %arg24: memref<1x18x32xf32, #tpu.memory_space<vmem>>, %arg25: memref<1x2x9x72xf32, #tpu.memory_space<vmem>>, %arg26: memref<1x2x9x72xf32, #tpu.memory_space<vmem>>) attributes {dimension_semantics = [#tpu.dimension_semantics<parallel>], iteration_bounds = array<i64: 1>, scalar_prefetch = 0 : i64, scratch_operands = 0 : i64, tpu.core_type = #tpu.core_type<tc>, window_params = [{transform_indices = @transform_0, window_bounds = array<i64: 1, 18, 16>}, {transform_indices = @transform_1, window_bounds = array<i64: 1, 18, 32>}, {transform_indices = @transform_2, window_bounds = array<i64: 1, 2, 1, 72>}, {pipeline_mode = #tpu.pipeline_mode<synchronous>, transform_indices = @transform_3, window_bounds = array<i64: 72, 9>}, {pipeline_mode = #tpu.pipeline_mode<synchronous>, transform_indices = @transform_4, window_bounds = array<i64: 72, 32>}, {pipeline_mode = #tpu.pipeline_mode<synchronous>, transform_indices = @transform_5, window_bounds = array<i64: 72, 72>}, {pipeline_mode = #tpu.pipeline_mode<synchronous>, transform_indices = @transform_6, window_bounds = array<i64: 1, 16>}, {pipeline_mode = #tpu.pipeline_mode<synchronous>, transform_indices = @transform_7, window_bounds = array<i64: 1, 16>}, {pipeline_mode = #tpu.pipeline_mode<synchronous>, transform_indices = @transform_8, window_bounds = array<i64: 16, 32>}, {pipeline_mode = #tpu.pipeline_mode<synchronous>, transform_indices = @transform_9, window_bounds = array<i64: 1, 32>}, {pipeline_mode = #tpu.pipeline_mode<synchronous>, transform_indices = @transform_10, window_bounds = array<i64: 1, 32>}, {pipeline_mode = #tpu.pipeline_mode<synchronous>, transform_indices = @transform_11, window_bounds = array<i64: 1, 32>}, {pipeline_mode = #tpu.pipeline_mode<synchronous>, transform_indices = @transform_12, window_bounds = array<i64: 32, 32>}, {pipeline_mode = #tpu.pipeline_mode<synchronous>, transform_indices = @transform_13, window_bounds = array<i64: 32, 32>}, {pipeline_mode = #tpu.pipeline_mode<synchronous>, transform_indices = @transform_14, window_bounds = array<i64: 32, 32>}, {pipeline_mode = #tpu.pipeline_mode<synchronous>, transform_indices = @transform_15, window_bounds = array<i64: 32, 32>}, {pipeline_mode = #tpu.pipeline_mode<synchronous>, transform_indices = @transform_16, window_bounds = array<i64: 1, 32>}, {pipeline_mode = #tpu.pipeline_mode<synchronous>, transform_indices = @transform_17, window_bounds = array<i64: 1, 32>}, {pipeline_mode = #tpu.pipeline_mode<synchronous>, transform_indices = @transform_18, window_bounds = array<i64: 1, 32>}, {pipeline_mode = #tpu.pipeline_mode<synchronous>, transform_indices = @transform_19, window_bounds = array<i64: 32, 64>}, {pipeline_mode = #tpu.pipeline_mode<synchronous>, transform_indices = @transform_20, window_bounds = array<i64: 1, 64>}, {pipeline_mode = #tpu.pipeline_mode<synchronous>, transform_indices = @transform_21, window_bounds = array<i64: 64, 32>}, {pipeline_mode = #tpu.pipeline_mode<synchronous>, transform_indices = @transform_22, window_bounds = array<i64: 1, 32>}, {transform_indices = @transform_23, window_bounds = array<i64: 1, 18, 32>}, {transform_indices = @transform_24, window_bounds = array<i64: 1, 2, 9, 72>}, {transform_indices = @transform_25, window_bounds = array<i64: 1, 2, 9, 72>}]} {
    %c0 = arith.constant 0 : index
    %c0_0 = arith.constant 0 : index
    %c0_1 = arith.constant 0 : index
    %0 = vector.load %arg1[%c0, %c0_0, %c0_1] : memref<1x18x16xf32, #tpu.memory_space<vmem>>, vector<1x18x16xf32>
    %1 = vector.shape_cast %0 : vector<1x18x16xf32> to vector<18x16xf32>
    %c0_2 = arith.constant 0 : index
    %c0_3 = arith.constant 0 : index
    %c0_4 = arith.constant 0 : index
    %2 = vector.load %arg2[%c0_2, %c0_3, %c0_4] : memref<1x18x32xf32, #tpu.memory_space<vmem>>, vector<1x18x32xf32>
    %3 = vector.shape_cast %2 : vector<1x18x32xf32> to vector<18x32xf32>
    %c0_5 = arith.constant 0 : index
    %c0_6 = arith.constant 0 : index
    %4 = vector.load %arg7[%c0_5, %c0_6] : memref<1x16xf32, #tpu.memory_space<vmem>>, vector<1x16xf32>
    %c0_7 = arith.constant 0 : index
    %c0_8 = arith.constant 0 : index
    %5 = vector.load %arg8[%c0_7, %c0_8] : memref<1x16xf32, #tpu.memory_space<vmem>>, vector<1x16xf32>
    %cst = arith.constant dense<0.000000e+00> : vector<18xf32>
    %6 = vector.multi_reduction <add>, %1, %cst [1] : vector<18x16xf32> to vector<18xf32>
    %7 = vector.shape_cast %6 : vector<18xf32> to vector<18x1xf32>
    %cst_9 = arith.constant 1.600000e+01 : f32
    %8 = vector.broadcast %cst_9 : f32 to vector<18x1xf32>
    %9 = arith.divf %7, %8 : vector<18x1xf32>
    %10 = vector.broadcast %9 : vector<18x1xf32> to vector<18x16xf32>
    %11 = arith.subf %1, %10 : vector<18x16xf32>
    %12 = arith.mulf %11, %11 : vector<18x16xf32>
    %cst_10 = arith.constant dense<0.000000e+00> : vector<18xf32>
    %13 = vector.multi_reduction <add>, %12, %cst_10 [1] : vector<18x16xf32> to vector<18xf32>
    %14 = vector.shape_cast %13 : vector<18xf32> to vector<18x1xf32>
    %cst_11 = arith.constant 1.600000e+01 : f32
    %15 = vector.broadcast %cst_11 : f32 to vector<18x1xf32>
    %16 = arith.divf %14, %15 : vector<18x1xf32>
    %17 = vector.broadcast %9 : vector<18x1xf32> to vector<18x16xf32>
    %18 = arith.subf %1, %17 : vector<18x16xf32>
    %cst_12 = arith.constant 9.99999974E-6 : f32
    %19 = vector.broadcast %cst_12 : f32 to vector<18x1xf32>
    %20 = arith.addf %16, %19 : vector<18x1xf32>
    %21 = math.rsqrt %20 : vector<18x1xf32>
    %22 = vector.broadcast %21 : vector<18x1xf32> to vector<18x16xf32>
    %23 = arith.mulf %18, %22 : vector<18x16xf32>
    %24 = vector.broadcast %4 : vector<1x16xf32> to vector<18x16xf32>
    %25 = arith.mulf %23, %24 : vector<18x16xf32>
    %26 = vector.broadcast %5 : vector<1x16xf32> to vector<18x16xf32>
    %27 = arith.addf %25, %26 : vector<18x16xf32>
    %28 = arith.truncf %27 : vector<18x16xf32> to vector<18x16xbf16>
    %c0_13 = arith.constant 0 : index
    %c0_14 = arith.constant 0 : index
    %29 = vector.load %arg9[%c0_13, %c0_14] : memref<16x32xbf16, #tpu.memory_space<vmem>>, vector<16x32xbf16>
    %cst_15 = arith.constant dense<0.000000e+00> : vector<18x32xf32>
    %30 = tpu.matmul %28, %29, %cst_15 {dimension_numbers = #tpu.dot_dimension_numbers<[1], [0], [0], [1], [0, 0, 1, 1], [], []>} : vector<18x16xbf16>, vector<16x32xbf16>, vector<18x32xf32> -> vector<18x32xf32>
    %c0_16 = arith.constant 0 : index
    %c0_17 = arith.constant 0 : index
    %31 = vector.load %arg10[%c0_16, %c0_17] : memref<1x32xf32, #tpu.memory_space<vmem>>, vector<1x32xf32>
    %32 = vector.broadcast %31 : vector<1x32xf32> to vector<18x32xf32>
    %33 = arith.addf %30, %32 : vector<18x32xf32>
    %34 = arith.addf %33, %3 : vector<18x32xf32>
    %c0_18 = arith.constant 0 : index
    %c0_19 = arith.constant 0 : index
    %35 = vector.load %arg11[%c0_18, %c0_19] : memref<1x32xf32, #tpu.memory_space<vmem>>, vector<1x32xf32>
    %c0_20 = arith.constant 0 : index
    %c0_21 = arith.constant 0 : index
    %36 = vector.load %arg12[%c0_20, %c0_21] : memref<1x32xf32, #tpu.memory_space<vmem>>, vector<1x32xf32>
    %cst_22 = arith.constant dense<0.000000e+00> : vector<18xf32>
    %37 = vector.multi_reduction <add>, %34, %cst_22 [1] : vector<18x32xf32> to vector<18xf32>
    %38 = vector.shape_cast %37 : vector<18xf32> to vector<18x1xf32>
    %cst_23 = arith.constant 3.200000e+01 : f32
    %39 = vector.broadcast %cst_23 : f32 to vector<18x1xf32>
    %40 = arith.divf %38, %39 : vector<18x1xf32>
    %41 = vector.broadcast %40 : vector<18x1xf32> to vector<18x32xf32>
    %42 = arith.subf %34, %41 : vector<18x32xf32>
    %43 = arith.mulf %42, %42 : vector<18x32xf32>
    %cst_24 = arith.constant dense<0.000000e+00> : vector<18xf32>
    %44 = vector.multi_reduction <add>, %43, %cst_24 [1] : vector<18x32xf32> to vector<18xf32>
    %45 = vector.shape_cast %44 : vector<18xf32> to vector<18x1xf32>
    %cst_25 = arith.constant 3.200000e+01 : f32
    %46 = vector.broadcast %cst_25 : f32 to vector<18x1xf32>
    %47 = arith.divf %45, %46 : vector<18x1xf32>
    %48 = vector.broadcast %40 : vector<18x1xf32> to vector<18x32xf32>
    %49 = arith.subf %34, %48 : vector<18x32xf32>
    %cst_26 = arith.constant 9.99999974E-6 : f32
    %50 = vector.broadcast %cst_26 : f32 to vector<18x1xf32>
    %51 = arith.addf %47, %50 : vector<18x1xf32>
    %52 = math.rsqrt %51 : vector<18x1xf32>
    %53 = vector.broadcast %52 : vector<18x1xf32> to vector<18x32xf32>
    %54 = arith.mulf %49, %53 : vector<18x32xf32>
    %55 = vector.broadcast %35 : vector<1x32xf32> to vector<18x32xf32>
    %56 = arith.mulf %54, %55 : vector<18x32xf32>
    %57 = vector.broadcast %36 : vector<1x32xf32> to vector<18x32xf32>
    %58 = arith.addf %56, %57 : vector<18x32xf32>
    %59 = arith.truncf %58 : vector<18x32xf32> to vector<18x32xbf16>
    %c0_27 = arith.constant 0 : index
    %c0_28 = arith.constant 0 : index
    %60 = vector.load %arg13[%c0_27, %c0_28] : memref<32x32xbf16, #tpu.memory_space<vmem>>, vector<32x32xbf16>
    %cst_29 = arith.constant dense<0.000000e+00> : vector<18x32xf32>
    %61 = tpu.matmul %59, %60, %cst_29 {dimension_numbers = #tpu.dot_dimension_numbers<[1], [0], [0], [1], [0, 0, 1, 1], [], []>} : vector<18x32xbf16>, vector<32x32xbf16>, vector<18x32xf32> -> vector<18x32xf32>
    %c0_30 = arith.constant 0 : index
    %c0_31 = arith.constant 0 : index
    %62 = vector.load %arg14[%c0_30, %c0_31] : memref<32x32xbf16, #tpu.memory_space<vmem>>, vector<32x32xbf16>
    %cst_32 = arith.constant dense<0.000000e+00> : vector<18x32xf32>
    %63 = tpu.matmul %59, %62, %cst_32 {dimension_numbers = #tpu.dot_dimension_numbers<[1], [0], [0], [1], [0, 0, 1, 1], [], []>} : vector<18x32xbf16>, vector<32x32xbf16>, vector<18x32xf32> -> vector<18x32xf32>
    %c0_33 = arith.constant 0 : index
    %c0_34 = arith.constant 0 : index
    %64 = vector.load %arg15[%c0_33, %c0_34] : memref<32x32xbf16, #tpu.memory_space<vmem>>, vector<32x32xbf16>
    %cst_35 = arith.constant dense<0.000000e+00> : vector<18x32xf32>
    %65 = tpu.matmul %59, %64, %cst_35 {dimension_numbers = #tpu.dot_dimension_numbers<[1], [0], [0], [1], [0, 0, 1, 1], [], []>} : vector<18x32xbf16>, vector<32x32xbf16>, vector<18x32xf32> -> vector<18x32xf32>
    %c0_36 = arith.constant 0 : index
    %c0_37 = arith.constant 0 : index
    %66 = vector.load %arg4[%c0_36, %c0_37] : memref<72x9xbf16, #tpu.memory_space<vmem>>, vector<72x9xbf16>
    %c0_38 = arith.constant 0 : index
    %c0_39 = arith.constant 0 : index
    %67 = vector.load %arg5[%c0_38, %c0_39] : memref<72x32xf32, #tpu.memory_space<vmem>>, vector<72x32xf32>
    %c0_40 = arith.constant 0 : index
    %c0_41 = arith.constant 0 : index
    %68 = vector.load %arg6[%c0_40, %c0_41] : memref<72x72xbf16, #tpu.memory_space<vmem>>, vector<72x72xbf16>
    %69 = vector.extract_strided_slice %61 {offsets = [0, 0], sizes = [9, 32], strides = [1, 1]} : vector<18x32xf32> to vector<9x32xf32>
    %70 = arith.truncf %69 : vector<9x32xf32> to vector<9x32xbf16>
    %71 = vector.extract_strided_slice %63 {offsets = [0, 0], sizes = [9, 32], strides = [1, 1]} : vector<18x32xf32> to vector<9x32xf32>
    %72 = arith.truncf %71 : vector<9x32xf32> to vector<9x32xbf16>
    %73 = vector.extract_strided_slice %65 {offsets = [0, 0], sizes = [9, 32], strides = [1, 1]} : vector<18x32xf32> to vector<9x32xf32>
    %74 = arith.truncf %73 : vector<9x32xf32> to vector<9x32xbf16>
    %cst_42 = arith.constant dense<0.000000e+00> : vector<72x32xf32>
    %75 = tpu.matmul %66, %72, %cst_42 {dimension_numbers = #tpu.dot_dimension_numbers<[1], [0], [0], [1], [0, 0, 1, 1], [], []>} : vector<72x9xbf16>, vector<9x32xbf16>, vector<72x32xf32> -> vector<72x32xf32>
    %76 = arith.mulf %75, %67 : vector<72x32xf32>
    %77 = arith.truncf %76 : vector<72x32xf32> to vector<72x32xbf16>
    %cst_43 = arith.constant dense<0.000000e+00> : vector<72x32xf32>
    %78 = tpu.matmul %66, %74, %cst_43 {dimension_numbers = #tpu.dot_dimension_numbers<[1], [0], [0], [1], [0, 0, 1, 1], [], []>} : vector<72x9xbf16>, vector<9x32xbf16>, vector<72x32xf32> -> vector<72x32xf32>
    %79 = arith.mulf %78, %67 : vector<72x32xf32>
    %80 = arith.truncf %79 : vector<72x32xf32> to vector<72x32xbf16>
    %cst_44 = arith.constant dense<0.000000e+00> : vector<9x72xf32>
    %81 = tpu.matmul %70, %77, %cst_44 {dimension_numbers = #tpu.dot_dimension_numbers<[1], [1], [0], [0], [0, 0, 1, 0], [], []>} : vector<9x32xbf16>, vector<72x32xbf16>, vector<9x72xf32> -> vector<9x72xf32>
    %c0_45 = arith.constant 0 : index
    %c0_46 = arith.constant 0 : index
    %c0_47 = arith.constant 0 : index
    %c0_48 = arith.constant 0 : index
    %82 = vector.load %arg3[%c0_45, %c0_46, %c0_47, %c0_48] : memref<1x2x1x72xf32, #tpu.memory_space<vmem>>, vector<1x1x1x72xf32>
    %83 = vector.shape_cast %82 : vector<1x1x1x72xf32> to vector<1x72xf32>
    %cst_49 = arith.constant 0.000000e+00 : f32
    %84 = vector.broadcast %cst_49 : f32 to vector<1x72xf32>
    %85 = arith.cmpf ogt, %83, %84 : vector<1x72xf32>
    %cst_50 = arith.constant -1.000000e+30 : f32
    %86 = vector.shape_cast %85 : vector<1x72xi1> to vector<1x72xi1>
    %87 = vector.broadcast %86 : vector<1x72xi1> to vector<9x72xi1>
    %88 = vector.broadcast %cst_50 : f32 to vector<9x72xf32>
    %89 = arith.select %87, %88, %81 : vector<9x72xi1>, vector<9x72xf32>
    %c0_51 = arith.constant 0 : index
    %c0_52 = arith.constant 0 : index
    %c0_53 = arith.constant 0 : index
    %c0_54 = arith.constant 0 : index
    %90 = vector.load %arg26[%c0_51, %c0_52, %c0_53, %c0_54] : memref<1x2x9x72xf32, #tpu.memory_space<vmem>>, vector<1x1x9x72xf32>
    %91 = vector.shape_cast %90 : vector<1x1x9x72xf32> to vector<9x72xf32>
    %92 = vector.shape_cast %89 : vector<9x72xf32> to vector<1x1x9x72xf32>
    tpu.vector_store %arg26[%c0_51, %c0_52, %c0_53, %c0_54], %92 {strides = array<i32>} : memref<1x2x9x72xf32, #tpu.memory_space<vmem>>, vector<1x1x9x72xf32>,
    %cst_55 = arith.constant dense<0xFF800000> : vector<9xf32>
    %93 = vector.multi_reduction <maximumf>, %89, %cst_55 [1] : vector<9x72xf32> to vector<9xf32>
    %94 = vector.shape_cast %93 : vector<9xf32> to vector<9x1xf32>
    %95 = vector.broadcast %94 : vector<9x1xf32> to vector<9x72xf32>
    %96 = arith.subf %89, %95 : vector<9x72xf32>
    %97 = math.exp %96 : vector<9x72xf32>
    %98 = arith.truncf %97 : vector<9x72xf32> to vector<9x72xbf16>
    %cst_56 = arith.constant dense<0.000000e+00> : vector<9x72xf32>
    %99 = tpu.matmul %98, %68, %cst_56 {dimension_numbers = #tpu.dot_dimension_numbers<[1], [0], [0], [1], [0, 0, 1, 1], [], []>} : vector<9x72xbf16>, vector<72x72xbf16>, vector<9x72xf32> -> vector<9x72xf32>
    %100 = tpu.reciprocal %99 {approx = true} : vector<9x72xf32> -> vector<9x72xf32>
    %101 = arith.mulf %97, %100 : vector<9x72xf32>
    %c0_57 = arith.constant 0 : index
    %c0_58 = arith.constant 0 : index
    %c0_59 = arith.constant 0 : index
    %c0_60 = arith.constant 0 : index
    %102 = vector.load %arg25[%c0_57, %c0_58, %c0_59, %c0_60] : memref<1x2x9x72xf32, #tpu.memory_space<vmem>>, vector<1x1x9x72xf32>
    %103 = vector.shape_cast %102 : vector<1x1x9x72xf32> to vector<9x72xf32>
    %104 = vector.shape_cast %101 : vector<9x72xf32> to vector<1x1x9x72xf32>
    tpu.vector_store %arg25[%c0_57, %c0_58, %c0_59, %c0_60], %104 {strides = array<i32>} : memref<1x2x9x72xf32, #tpu.memory_space<vmem>>, vector<1x1x9x72xf32>,
    %105 = arith.truncf %101 : vector<9x72xf32> to vector<9x72xbf16>
    %cst_61 = arith.constant dense<0.000000e+00> : vector<9x32xf32>
    %106 = tpu.matmul %105, %80, %cst_61 {dimension_numbers = #tpu.dot_dimension_numbers<[1], [0], [0], [1], [0, 0, 1, 1], [], []>} : vector<9x72xbf16>, vector<72x32xbf16>, vector<9x32xf32> -> vector<9x32xf32>
    %107 = vector.extract_strided_slice %61 {offsets = [9, 0], sizes = [9, 32], strides = [1, 1]} : vector<18x32xf32> to vector<9x32xf32>
    %108 = arith.truncf %107 : vector<9x32xf32> to vector<9x32xbf16>
    %109 = vector.extract_strided_slice %63 {offsets = [9, 0], sizes = [9, 32], strides = [1, 1]} : vector<18x32xf32> to vector<9x32xf32>
    %110 = arith.truncf %109 : vector<9x32xf32> to vector<9x32xbf16>
    %111 = vector.extract_strided_slice %65 {offsets = [9, 0], sizes = [9, 32], strides = [1, 1]} : vector<18x32xf32> to vector<9x32xf32>
    %112 = arith.truncf %111 : vector<9x32xf32> to vector<9x32xbf16>
    %cst_62 = arith.constant dense<0.000000e+00> : vector<72x32xf32>
    %113 = tpu.matmul %66, %110, %cst_62 {dimension_numbers = #tpu.dot_dimension_numbers<[1], [0], [0], [1], [0, 0, 1, 1], [], []>} : vector<72x9xbf16>, vector<9x32xbf16>, vector<72x32xf32> -> vector<72x32xf32>
    %114 = arith.mulf %113, %67 : vector<72x32xf32>
    %115 = arith.truncf %114 : vector<72x32xf32> to vector<72x32xbf16>
    %cst_63 = arith.constant dense<0.000000e+00> : vector<72x32xf32>
    %116 = tpu.matmul %66, %112, %cst_63 {dimension_numbers = #tpu.dot_dimension_numbers<[1], [0], [0], [1], [0, 0, 1, 1], [], []>} : vector<72x9xbf16>, vector<9x32xbf16>, vector<72x32xf32> -> vector<72x32xf32>
    %117 = arith.mulf %116, %67 : vector<72x32xf32>
    %118 = arith.truncf %117 : vector<72x32xf32> to vector<72x32xbf16>
    %cst_64 = arith.constant dense<0.000000e+00> : vector<9x72xf32>
    %119 = tpu.matmul %108, %115, %cst_64 {dimension_numbers = #tpu.dot_dimension_numbers<[1], [1], [0], [0], [0, 0, 1, 0], [], []>} : vector<9x32xbf16>, vector<72x32xbf16>, vector<9x72xf32> -> vector<9x72xf32>
    %c0_65 = arith.constant 0 : index
    %c1 = arith.constant 1 : index
    %c0_66 = arith.constant 0 : index
    %c0_67 = arith.constant 0 : index
    %120 = vector.load %arg3[%c0_65, %c1, %c0_66, %c0_67] : memref<1x2x1x72xf32, #tpu.memory_space<vmem>>, vector<1x1x1x72xf32>
    %121 = vector.shape_cast %120 : vector<1x1x1x72xf32> to vector<1x72xf32>
    %cst_68 = arith.constant 0.000000e+00 : f32
    %122 = vector.broadcast %cst_68 : f32 to vector<1x72xf32>
    %123 = arith.cmpf ogt, %121, %122 : vector<1x72xf32>
    %cst_69 = arith.constant -1.000000e+30 : f32
    %124 = vector.shape_cast %123 : vector<1x72xi1> to vector<1x72xi1>
    %125 = vector.broadcast %124 : vector<1x72xi1> to vector<9x72xi1>
    %126 = vector.broadcast %cst_69 : f32 to vector<9x72xf32>
    %127 = arith.select %125, %126, %119 : vector<9x72xi1>, vector<9x72xf32>
    %c0_70 = arith.constant 0 : index
    %c1_71 = arith.constant 1 : index
    %c0_72 = arith.constant 0 : index
    %c0_73 = arith.constant 0 : index
    %128 = vector.load %arg26[%c0_70, %c1_71, %c0_72, %c0_73] : memref<1x2x9x72xf32, #tpu.memory_space<vmem>>, vector<1x1x9x72xf32>
    %129 = vector.shape_cast %128 : vector<1x1x9x72xf32> to vector<9x72xf32>
    %130 = vector.shape_cast %127 : vector<9x72xf32> to vector<1x1x9x72xf32>
    tpu.vector_store %arg26[%c0_70, %c1_71, %c0_72, %c0_73], %130 {strides = array<i32>} : memref<1x2x9x72xf32, #tpu.memory_space<vmem>>, vector<1x1x9x72xf32>,
    %cst_74 = arith.constant dense<0xFF800000> : vector<9xf32>
    %131 = vector.multi_reduction <maximumf>, %127, %cst_74 [1] : vector<9x72xf32> to vector<9xf32>
    %132 = vector.shape_cast %131 : vector<9xf32> to vector<9x1xf32>
    %133 = vector.broadcast %132 : vector<9x1xf32> to vector<9x72xf32>
    %134 = arith.subf %127, %133 : vector<9x72xf32>
    %135 = math.exp %134 : vector<9x72xf32>
    %136 = arith.truncf %135 : vector<9x72xf32> to vector<9x72xbf16>
    %cst_75 = arith.constant dense<0.000000e+00> : vector<9x72xf32>
    %137 = tpu.matmul %136, %68, %cst_75 {dimension_numbers = #tpu.dot_dimension_numbers<[1], [0], [0], [1], [0, 0, 1, 1], [], []>} : vector<9x72xbf16>, vector<72x72xbf16>, vector<9x72xf32> -> vector<9x72xf32>
    %138 = tpu.reciprocal %137 {approx = true} : vector<9x72xf32> -> vector<9x72xf32>
    %139 = arith.mulf %135, %138 : vector<9x72xf32>
    %c0_76 = arith.constant 0 : index
    %c1_77 = arith.constant 1 : index
    %c0_78 = arith.constant 0 : index
    %c0_79 = arith.constant 0 : index
    %140 = vector.load %arg25[%c0_76, %c1_77, %c0_78, %c0_79] : memref<1x2x9x72xf32, #tpu.memory_space<vmem>>, vector<1x1x9x72xf32>
    %141 = vector.shape_cast %140 : vector<1x1x9x72xf32> to vector<9x72xf32>
    %142 = vector.shape_cast %139 : vector<9x72xf32> to vector<1x1x9x72xf32>
    tpu.vector_store %arg25[%c0_76, %c1_77, %c0_78, %c0_79], %142 {strides = array<i32>} : memref<1x2x9x72xf32, #tpu.memory_space<vmem>>, vector<1x1x9x72xf32>,
    %143 = arith.truncf %139 : vector<9x72xf32> to vector<9x72xbf16>
    %cst_80 = arith.constant dense<0.000000e+00> : vector<9x32xf32>
    %144 = tpu.matmul %143, %118, %cst_80 {dimension_numbers = #tpu.dot_dimension_numbers<[1], [0], [0], [1], [0, 0, 1, 1], [], []>} : vector<9x72xbf16>, vector<72x32xbf16>, vector<9x32xf32> -> vector<9x32xf32>
    %145 = tpu.concatenate %106, %144 in 0 : vector<9x32xf32>, vector<9x32xf32> -> vector<18x32xf32>
    %146 = arith.truncf %145 : vector<18x32xf32> to vector<18x32xbf16>
    %c0_81 = arith.constant 0 : index
    %c0_82 = arith.constant 0 : index
    %147 = vector.load %arg16[%c0_81, %c0_82] : memref<32x32xbf16, #tpu.memory_space<vmem>>, vector<32x32xbf16>
    %cst_83 = arith.constant dense<0.000000e+00> : vector<18x32xf32>
    %148 = tpu.matmul %146, %147, %cst_83 {dimension_numbers = #tpu.dot_dimension_numbers<[1], [0], [0], [1], [0, 0, 1, 1], [], []>} : vector<18x32xbf16>, vector<32x32xbf16>, vector<18x32xf32> -> vector<18x32xf32>
    %c0_84 = arith.constant 0 : index
    %c0_85 = arith.constant 0 : index
    %149 = vector.load %arg17[%c0_84, %c0_85] : memref<1x32xf32, #tpu.memory_space<vmem>>, vector<1x32xf32>
    %150 = vector.broadcast %149 : vector<1x32xf32> to vector<18x32xf32>
    %151 = arith.addf %148, %150 : vector<18x32xf32>
    %152 = arith.addf %34, %151 : vector<18x32xf32>
    %c0_86 = arith.constant 0 : index
    %c0_87 = arith.constant 0 : index
    %153 = vector.load %arg18[%c0_86, %c0_87] : memref<1x32xf32, #tpu.memory_space<vmem>>, vector<1x32xf32>
    %c0_88 = arith.constant 0 : index
    %c0_89 = arith.constant 0 : index
    %154 = vector.load %arg19[%c0_88, %c0_89] : memref<1x32xf32, #tpu.memory_space<vmem>>, vector<1x32xf32>
    %cst_90 = arith.constant dense<0.000000e+00> : vector<18xf32>
    %155 = vector.multi_reduction <add>, %152, %cst_90 [1] : vector<18x32xf32> to vector<18xf32>
    %156 = vector.shape_cast %155 : vector<18xf32> to vector<18x1xf32>
    %cst_91 = arith.constant 3.200000e+01 : f32
    %157 = vector.broadcast %cst_91 : f32 to vector<18x1xf32>
    %158 = arith.divf %156, %157 : vector<18x1xf32>
    %159 = vector.broadcast %158 : vector<18x1xf32> to vector<18x32xf32>
    %160 = arith.subf %152, %159 : vector<18x32xf32>
    %161 = arith.mulf %160, %160 : vector<18x32xf32>
    %cst_92 = arith.constant dense<0.000000e+00> : vector<18xf32>
    %162 = vector.multi_reduction <add>, %161, %cst_92 [1] : vector<18x32xf32> to vector<18xf32>
    %163 = vector.shape_cast %162 : vector<18xf32> to vector<18x1xf32>
    %cst_93 = arith.constant 3.200000e+01 : f32
    %164 = vector.broadcast %cst_93 : f32 to vector<18x1xf32>
    %165 = arith.divf %163, %164 : vector<18x1xf32>
    %166 = vector.broadcast %158 : vector<18x1xf32> to vector<18x32xf32>
    %167 = arith.subf %152, %166 : vector<18x32xf32>
    %cst_94 = arith.constant 9.99999974E-6 : f32
    %168 = vector.broadcast %cst_94 : f32 to vector<18x1xf32>
    %169 = arith.addf %165, %168 : vector<18x1xf32>
    %170 = math.rsqrt %169 : vector<18x1xf32>
    %171 = vector.broadcast %170 : vector<18x1xf32> to vector<18x32xf32>
    %172 = arith.mulf %167, %171 : vector<18x32xf32>
    %173 = vector.broadcast %153 : vector<1x32xf32> to vector<18x32xf32>
    %174 = arith.mulf %172, %173 : vector<18x32xf32>
    %175 = vector.broadcast %154 : vector<1x32xf32> to vector<18x32xf32>
    %176 = arith.addf %174, %175 : vector<18x32xf32>
    %177 = arith.truncf %176 : vector<18x32xf32> to vector<18x32xbf16>
    %c0_95 = arith.constant 0 : index
    %c0_96 = arith.constant 0 : index
    %178 = vector.load %arg20[%c0_95, %c0_96] : memref<32x64xbf16, #tpu.memory_space<vmem>>, vector<32x64xbf16>
    %cst_97 = arith.constant dense<0.000000e+00> : vector<18x64xf32>
    %179 = tpu.matmul %177, %178, %cst_97 {dimension_numbers = #tpu.dot_dimension_numbers<[1], [0], [0], [1], [0, 0, 1, 1], [], []>} : vector<18x32xbf16>, vector<32x64xbf16>, vector<18x64xf32> -> vector<18x64xf32>
    %c0_98 = arith.constant 0 : index
    %c0_99 = arith.constant 0 : index
    %180 = vector.load %arg21[%c0_98, %c0_99] : memref<1x64xf32, #tpu.memory_space<vmem>>, vector<1x64xf32>
    %181 = vector.broadcast %180 : vector<1x64xf32> to vector<18x64xf32>
    %182 = arith.addf %179, %181 : vector<18x64xf32>
    %cst_100 = arith.constant 5.000000e-01 : f32
    %183 = vector.broadcast %cst_100 : f32 to vector<18x64xf32>
    %184 = arith.mulf %183, %182 : vector<18x64xf32>
    %cst_101 = arith.constant 0.707106769 : f32
    %185 = vector.broadcast %cst_101 : f32 to vector<18x64xf32>
    %186 = arith.mulf %182, %185 : vector<18x64xf32>
    %cst_102 = arith.constant 0.000000e+00 : f32
    %187 = vector.broadcast %cst_102 : f32 to vector<18x64xf32>
    %188 = arith.cmpf oge, %186, %187 : vector<18x64xf32>
    %cst_103 = arith.constant 1.000000e+00 : f32
    %cst_104 = arith.constant -1.000000e+00 : f32
    %189 = vector.broadcast %cst_103 : f32 to vector<18x64xf32>
    %190 = vector.broadcast %cst_104 : f32 to vector<18x64xf32>
    %191 = arith.select %188, %189, %190 : vector<18x64xi1>, vector<18x64xf32>
    %192 = math.absf %186 : vector<18x64xf32>
    %cst_105 = arith.constant 0.327591091 : f32
    %193 = vector.broadcast %cst_105 : f32 to vector<18x64xf32>
    %194 = arith.mulf %193, %192 : vector<18x64xf32>
    %cst_106 = arith.constant 1.000000e+00 : f32
    %195 = vector.broadcast %cst_106 : f32 to vector<18x64xf32>
    %196 = arith.addf %195, %194 : vector<18x64xf32>
    %cst_107 = arith.constant 1.000000e+00 : f32
    %197 = vector.broadcast %cst_107 : f32 to vector<18x64xf32>
    %198 = arith.divf %197, %196 : vector<18x64xf32>
    %cst_108 = arith.constant 1.06140542 : f32
    %199 = vector.broadcast %cst_108 : f32 to vector<18x64xf32>
    %200 = arith.mulf %199, %198 : vector<18x64xf32>
    %cst_109 = arith.constant -1.45315206 : f32
    %201 = vector.broadcast %cst_109 : f32 to vector<18x64xf32>
    %202 = arith.addf %200, %201 : vector<18x64xf32>
    %203 = arith.mulf %202, %198 : vector<18x64xf32>
    %cst_110 = arith.constant 1.42141378 : f32
    %204 = vector.broadcast %cst_110 : f32 to vector<18x64xf32>
    %205 = arith.addf %203, %204 : vector<18x64xf32>
    %206 = arith.mulf %205, %198 : vector<18x64xf32>
    %cst_111 = arith.constant -0.284496725 : f32
    %207 = vector.broadcast %cst_111 : f32 to vector<18x64xf32>
    %208 = arith.addf %206, %207 : vector<18x64xf32>
    %209 = arith.mulf %208, %198 : vector<18x64xf32>
    %cst_112 = arith.constant 0.254829586 : f32
    %210 = vector.broadcast %cst_112 : f32 to vector<18x64xf32>
    %211 = arith.addf %209, %210 : vector<18x64xf32>
    %212 = arith.mulf %211, %198 : vector<18x64xf32>
    %cst_113 = arith.constant 0.000000e+00 : f32
    %213 = vector.broadcast %cst_113 : f32 to vector<18x64xf32>
    %214 = arith.subf %213, %192 : vector<18x64xf32>
    %215 = arith.mulf %214, %192 : vector<18x64xf32>
    %216 = math.exp %215 : vector<18x64xf32>
    %217 = arith.mulf %212, %216 : vector<18x64xf32>
    %cst_114 = arith.constant 1.000000e+00 : f32
    %218 = vector.broadcast %cst_114 : f32 to vector<18x64xf32>
    %219 = arith.subf %218, %217 : vector<18x64xf32>
    %220 = arith.mulf %191, %219 : vector<18x64xf32>
    %cst_115 = arith.constant 1.000000e+00 : f32
    %221 = vector.broadcast %cst_115 : f32 to vector<18x64xf32>
    %222 = arith.addf %221, %220 : vector<18x64xf32>
    %223 = arith.mulf %184, %222 : vector<18x64xf32>
    %224 = arith.truncf %223 : vector<18x64xf32> to vector<18x64xbf16>
    %c0_116 = arith.constant 0 : index
    %c0_117 = arith.constant 0 : index
    %225 = vector.load %arg22[%c0_116, %c0_117] : memref<64x32xbf16, #tpu.memory_space<vmem>>, vector<64x32xbf16>
    %cst_118 = arith.constant dense<0.000000e+00> : vector<18x32xf32>
    %226 = tpu.matmul %224, %225, %cst_118 {dimension_numbers = #tpu.dot_dimension_numbers<[1], [0], [0], [1], [0, 0, 1, 1], [], []>} : vector<18x64xbf16>, vector<64x32xbf16>, vector<18x32xf32> -> vector<18x32xf32>
    %c0_119 = arith.constant 0 : index
    %c0_120 = arith.constant 0 : index
    %227 = vector.load %arg23[%c0_119, %c0_120] : memref<1x32xf32, #tpu.memory_space<vmem>>, vector<1x32xf32>
    %228 = vector.broadcast %227 : vector<1x32xf32> to vector<18x32xf32>
    %229 = arith.addf %226, %228 : vector<18x32xf32>
    %230 = arith.addf %152, %229 : vector<18x32xf32>
    %c0_121 = arith.constant 0 : index
    %c0_122 = arith.constant 0 : index
    %c0_123 = arith.constant 0 : index
    %231 = vector.load %arg24[%c0_121, %c0_122, %c0_123] : memref<1x18x32xf32, #tpu.memory_space<vmem>>, vector<1x18x32xf32>
    %232 = vector.shape_cast %231 : vector<1x18x32xf32> to vector<18x32xf32>
    %233 = vector.shape_cast %230 : vector<18x32xf32> to vector<1x18x32xf32>
    tpu.vector_store %arg24[%c0_121, %c0_122, %c0_123], %233 {strides = array<i32>} : memref<1x18x32xf32, #tpu.memory_space<vmem>>, vector<1x18x32xf32>,
    return
  }
  func.func @transform_0(%arg0: i32) -> (i32, i32, i32) {
    %c0_i32 = arith.constant 0 : i32
    %c0_i32_0 = arith.constant 0 : i32
    %c0_i32_1 = arith.constant 0 : i32
    return %arg0, %c0_i32, %c0_i32_0 : i32, i32, i32
  }
  func.func @transform_1(%arg0: i32) -> (i32, i32, i32) {
    %c0_i32 = arith.constant 0 : i32
    %c0_i32_0 = arith.constant 0 : i32
    %c0_i32_1 = arith.constant 0 : i32
    return %arg0, %c0_i32, %c0_i32_0 : i32, i32, i32
  }
  func.func @transform_2(%arg0: i32) -> (i32, i32, i32, i32) {
    %c0_i32 = arith.constant 0 : i32
    %c0_i32_0 = arith.constant 0 : i32
    %c0_i32_1 = arith.constant 0 : i32
    %c0_i32_2 = arith.constant 0 : i32
    return %arg0, %c0_i32, %c0_i32_0, %c0_i32_1 : i32, i32, i32, i32
  }
  func.func @transform_3(%arg0: i32) -> (i32, i32) {
    %c0_i32 = arith.constant 0 : i32
    %c0_i32_0 = arith.constant 0 : i32
    %c0_i32_1 = arith.constant 0 : i32
    return %c0_i32, %c0_i32_0 : i32, i32
  }
  func.func @transform_4(%arg0: i32) -> (i32, i32) {
    %c0_i32 = arith.constant 0 : i32
    %c0_i32_0 = arith.constant 0 : i32
    %c0_i32_1 = arith.constant 0 : i32
    return %c0_i32, %c0_i32_0 : i32, i32
  }
  func.func @transform_5(%arg0: i32) -> (i32, i32) {
    %c0_i32 = arith.constant 0 : i32
    %c0_i32_0 = arith.constant 0 : i32
    %c0_i32_1 = arith.constant 0 : i32
    return %c0_i32, %c0_i32_0 : i32, i32
  }
  func.func @transform_6(%arg0: i32) -> (i32, i32) {
    %c0_i32 = arith.constant 0 : i32
    %c0_i32_0 = arith.constant 0 : i32
    %c0_i32_1 = arith.constant 0 : i32
    return %c0_i32, %c0_i32_0 : i32, i32
  }
  func.func @transform_7(%arg0: i32) -> (i32, i32) {
    %c0_i32 = arith.constant 0 : i32
    %c0_i32_0 = arith.constant 0 : i32
    %c0_i32_1 = arith.constant 0 : i32
    return %c0_i32, %c0_i32_0 : i32, i32
  }
  func.func @transform_8(%arg0: i32) -> (i32, i32) {
    %c0_i32 = arith.constant 0 : i32
    %c0_i32_0 = arith.constant 0 : i32
    %c0_i32_1 = arith.constant 0 : i32
    return %c0_i32, %c0_i32_0 : i32, i32
  }
  func.func @transform_9(%arg0: i32) -> (i32, i32) {
    %c0_i32 = arith.constant 0 : i32
    %c0_i32_0 = arith.constant 0 : i32
    %c0_i32_1 = arith.constant 0 : i32
    return %c0_i32, %c0_i32_0 : i32, i32
  }
  func.func @transform_10(%arg0: i32) -> (i32, i32) {
    %c0_i32 = arith.constant 0 : i32
    %c0_i32_0 = arith.constant 0 : i32
    %c0_i32_1 = arith.constant 0 : i32
    return %c0_i32, %c0_i32_0 : i32, i32
  }
  func.func @transform_11(%arg0: i32) -> (i32, i32) {
    %c0_i32 = arith.constant 0 : i32
    %c0_i32_0 = arith.constant 0 : i32
    %c0_i32_1 = arith.constant 0 : i32
    return %c0_i32, %c0_i32_0 : i32, i32
  }
  func.func @transform_12(%arg0: i32) -> (i32, i32) {
    %c0_i32 = arith.constant 0 : i32
    %c0_i32_0 = arith.constant 0 : i32
    %c0_i32_1 = arith.constant 0 : i32
    return %c0_i32, %c0_i32_0 : i32, i32
  }
  func.func @transform_13(%arg0: i32) -> (i32, i32) {
    %c0_i32 = arith.constant 0 : i32
    %c0_i32_0 = arith.constant 0 : i32
    %c0_i32_1 = arith.constant 0 : i32
    return %c0_i32, %c0_i32_0 : i32, i32
  }
  func.func @transform_14(%arg0: i32) -> (i32, i32) {
    %c0_i32 = arith.constant 0 : i32
    %c0_i32_0 = arith.constant 0 : i32
    %c0_i32_1 = arith.constant 0 : i32
    return %c0_i32, %c0_i32_0 : i32, i32
  }
  func.func @transform_15(%arg0: i32) -> (i32, i32) {
    %c0_i32 = arith.constant 0 : i32
    %c0_i32_0 = arith.constant 0 : i32
    %c0_i32_1 = arith.constant 0 : i32
    return %c0_i32, %c0_i32_0 : i32, i32
  }
  func.func @transform_16(%arg0: i32) -> (i32, i32) {
    %c0_i32 = arith.constant 0 : i32
    %c0_i32_0 = arith.constant 0 : i32
    %c0_i32_1 = arith.constant 0 : i32
    return %c0_i32, %c0_i32_0 : i32, i32
  }
  func.func @transform_17(%arg0: i32) -> (i32, i32) {
    %c0_i32 = arith.constant 0 : i32
    %c0_i32_0 = arith.constant 0 : i32
    %c0_i32_1 = arith.constant 0 : i32
    return %c0_i32, %c0_i32_0 : i32, i32
  }
  func.func @transform_18(%arg0: i32) -> (i32, i32) {
    %c0_i32 = arith.constant 0 : i32
    %c0_i32_0 = arith.constant 0 : i32
    %c0_i32_1 = arith.constant 0 : i32
    return %c0_i32, %c0_i32_0 : i32, i32
  }
  func.func @transform_19(%arg0: i32) -> (i32, i32) {
    %c0_i32 = arith.constant 0 : i32
    %c0_i32_0 = arith.constant 0 : i32
    %c0_i32_1 = arith.constant 0 : i32
    return %c0_i32, %c0_i32_0 : i32, i32
  }
  func.func @transform_20(%arg0: i32) -> (i32, i32) {
    %c0_i32 = arith.constant 0 : i32
    %c0_i32_0 = arith.constant 0 : i32
    %c0_i32_1 = arith.constant 0 : i32
    return %c0_i32, %c0_i32_0 : i32, i32
  }
  func.func @transform_21(%arg0: i32) -> (i32, i32) {
    %c0_i32 = arith.constant 0 : i32
    %c0_i32_0 = arith.constant 0 : i32
    %c0_i32_1 = arith.constant 0 : i32
    return %c0_i32, %c0_i32_0 : i32, i32
  }
  func.func @transform_22(%arg0: i32) -> (i32, i32) {
    %c0_i32 = arith.constant 0 : i32
    %c0_i32_0 = arith.constant 0 : i32
    %c0_i32_1 = arith.constant 0 : i32
    return %c0_i32, %c0_i32_0 : i32, i32
  }
  func.func @transform_23(%arg0: i32) -> (i32, i32, i32) {
    %c0_i32 = arith.constant 0 : i32
    %c0_i32_0 = arith.constant 0 : i32
    %c0_i32_1 = arith.constant 0 : i32
    return %arg0, %c0_i32, %c0_i32_0 : i32, i32, i32
  }
  func.func @transform_24(%arg0: i32) -> (i32, i32, i32, i32) {
    %c0_i32 = arith.constant 0 : i32
    %c0_i32_0 = arith.constant 0 : i32
    %c0_i32_1 = arith.constant 0 : i32
    %c0_i32_2 = arith.constant 0 : i32
    return %arg0, %c0_i32, %c0_i32_0, %c0_i32_1 : i32, i32, i32, i32
  }
  func.func @transform_25(%arg0: i32) -> (i32, i32, i32, i32) {
    %c0_i32 = arith.constant 0 : i32
    %c0_i32_0 = arith.constant 0 : i32
    %c0_i32_1 = arith.constant 0 : i32
    %c0_i32_2 = arith.constant 0 : i32
    return %arg0, %c0_i32, %c0_i32_0, %c0_i32_1 : i32, i32, i32, i32
  }
}

</mosaic_0001>

<bundles_post_ra>
// kernel: tpu_custom_call.1
= control target key start
LH: loop header
LB: loop body
LE: loop exit
PB: predicated region body
PF: predicated region fallthrough
CT: control target
= control target key end

     0   :  { %vm86_vm0 = vcmask 130048   ;;  %vm93_vm1 = vcmask 123904   ;;  %v1552_v6 = vmov 16.0   ;;  %vm216_vm12 = vcmask 261120   ;;  %s2211_s0 = inlined_call_operand.vmem [shape: f32[1,18,16], index: 0, kind: input, shape index: {}]   ;;  %s2212_s6 = inlined_call_operand.vmem [shape: f32[1,16], index: 6, kind: input, shape index: {}]   ;;  %s2213_s7 = inlined_call_operand.vmem [shape: f32[1,16], index: 7, kind: input, shape index: {}]   ;;  %s2214_s9 = inlined_call_operand.vmem [shape: f32[1,32], index: 9, kind: input, shape index: {}]   ;;  %s2215_s8 = inlined_call_operand.vmem [shape: bf16[16,32], index: 8, kind: input, shape index: {}]   ;;  %s2216_s1 = inlined_call_operand.vmem [shape: f32[1,18,32], index: 1, kind: input, shape index: {}]   ;;  %s2217_s10 = inlined_call_operand.vmem [shape: f32[1,32], index: 10, kind: input, shape index: {}]   ;;  %s2218_s11 = inlined_call_operand.vmem [shape: f32[1,32], index: 11, kind: input, shape index: {}]   ;;  %s2219_s12 = inlined_call_operand.vmem [shape: bf16[32,32], index: 12, kind: input, shape index: {}]   ;;  %s2220_s13 = inlined_call_operand.vmem [shape: bf16[32,32], index: 13, kind: input, shape index: {}]   ;;  %s2221_s14 = inlined_call_operand.vmem [shape: bf16[32,32], index: 14, kind: input, shape index: {}]   ;;  %s2222_s3 = inlined_call_operand.vmem [shape: bf16[72,9], index: 3, kind: input, shape index: {}]   ;;  %s2223_s4 = inlined_call_operand.vmem [shape: f32[72,32], index: 4, kind: input, shape index: {}]   ;;  %s2224_s2 = inlined_call_operand.vmem [shape: f32[1,2,1,72], index: 2, kind: input, shape index: {}]   ;;  %s2225_s25 = inlined_call_operand.vmem [shape: f32[1,2,9,72], index: 25, kind: output, shape index: {2}]   ;;  %s2226_s5 = inlined_call_operand.vmem [shape: bf16[72,72], index: 5, kind: input, shape index: {}]   ;;  %s2227_s24 = inlined_call_operand.vmem [shape: f32[1,2,9,72], index: 24, kind: output, shape index: {1}]   ;;  %s2228_s15 = inlined_call_operand.vmem [shape: bf16[32,32], index: 15, kind: input, shape index: {}]   ;;  %s2229_s16 = inlined_call_operand.vmem [shape: f32[1,32], index: 16, kind: input, shape index: {}]   ;;  %s2230_s17 = inlined_call_operand.vmem [shape: f32[1,32], index: 17, kind: input, shape index: {}]   ;;  %s2231_s18 = inlined_call_operand.vmem [shape: f32[1,32], index: 18, kind: input, shape index: {}]   ;;  %s2232_s19 = inlined_call_operand.vmem [shape: bf16[32,64], index: 19, kind: input, shape index: {}]   ;;  %s2233_s20 = inlined_call_operand.vmem [shape: f32[1,64], index: 20, kind: input, shape index: {}]   ;;  %s2234_s22 = inlined_call_operand.vmem [shape: f32[1,32], index: 22, kind: input, shape index: {}]   ;;  %s2235_s21 = inlined_call_operand.vmem [shape: bf16[64,32], index: 21, kind: input, shape index: {}]   ;;  %s2236_s23 = inlined_call_operand.vmem [shape: f32[1,18,32], index: 23, kind: output, shape index: {0}]  }
   0x1   :  { %2241 = sst [smem:[#allocation2_spill]] %s2211_s0  ;;  %1502 = vrcp.f32 %v1552_v6  ;;  %vm223_vm13 = vcmask 254976  }
   0x2   :  { %2242 = sst [smem:[#allocation3_spill]] %s2212_s6 }
   0x3   :  { %2243 = sst [smem:[#allocation4_spill]] %s2213_s7 }
   0x4   :  { %2244 = sst [smem:[#allocation5_spill]] %s2214_s9 }
   0x5   :  { %2245 = sst [smem:[#allocation6_spill]] %s2215_s8 }
   0x6   :  { %2246 = sst [smem:[#allocation7_spill]] %s2216_s1 }
   0x7   :  { %2247 = sst [smem:[#allocation8_spill]] %s2217_s10  ;;  %v1503_v7 = vpop.eup %1502 }
   0x8   :  { %2248 = sst [smem:[#allocation9_spill]] %s2218_s11  ;;  %v98_v8 = vmul.f32 16.0, %v1503_v7  ;;  %vm102_vm2 = vweird.f32 %v1503_v7 }
   0x9   :  { %2249 = sst [smem:[#allocation10_spill]] %s2219_s12 }
   0xa   :  { %2250 = sst [smem:[#allocation11_spill]] %s2220_s13  ;;  %v99_v9 = vsub.f32 1.0, %v98_v8 }
   0xb   :  { %s2251_s10 = sld [smem:[#allocation2_spill]] }
   0xc   :  { %v100_v10 = vmul.f32 %v1503_v7, %v99_v9  ;;  %s2252_s27 = sld [smem:[#allocation6_spill]] }
   0xd   :  { %s2253_s13 = sld [smem:[#allocation3_spill]] }
   0xe   :  { %v101_v11 = vadd.f32 %v1503_v7, %v100_v10  ;;  %s2254_s29 = sld [smem:[#allocation4_spill]] }
   0xf   :  { %s2255_s30 = sld [smem:[#allocation5_spill]] }
  0x10   :  { %v103_v12 = vsel %vm102_vm2, %v1503_v7, %v101_v11  ;;  %s2256_s26 = sld [smem:[#allocation7_spill]] }
  0x11   :  { %v78_v0 = vld [vmem:[%s2251_s10] sm:$0xff]  ;;  %v80_v1 = vld [vmem:[%s2251_s10 + $0x10] sm:$0x3]  ;;  %v79_v4 = vld [vmem:[%s2251_s10 + $0x8] sm:$0xff]  ;;  %s2257_s1 = sld [smem:[#allocation10_spill]] }
  0x12   :  { %v87_v2 = vsel %vm86_vm0, %v78_v0, 0.0  ;;  %v94_v3 = vsel %vm93_vm1, %v80_v1, 0.0  ;;  %v90_v5 = vsel %vm86_vm0, %v79_v4, 0.0  ;;  %v1463_v30 = vld [vmem:[%s2252_s27] sm:$0xff]  ;;  %s2258_s7 = sld [smem:[#allocation11_spill]] }
  0x13   :  { %88 = vadd.xlane.f32.xlu0 %v87_v2  ;;  %95 = vadd.xlane.f32.xlu2 %v94_v3  ;;  %v1492_v52 = vld [vmem:[%s2253_s13] ss:$0 sm:$0xff]  ;;  %s2259_s28 = sld [smem:[#allocation8_spill]] }
  0x14   :  { %200 = vmatpush.bf16.msra.mxu0 %v1463_v30  ;;  %1486 = vmatpush.bf16.msra.mxu3 %v1463_v30  ;;  %v1493_v59 = vld [vmem:[%s2254_s29] ss:$0 sm:$0xff]  ;;  %s2260_s0 = sld [smem:[#allocation9_spill]] }
  0x15   :  { %v1494_v8 = vld [vmem:[%s2255_s30] ss:$0 sm:$0xff] }
  0x16   :  { %v81_v9 = vld [vmem:[%s2256_s26] sm:$0xff] }
  0x1b   :  { %91 = vadd.xlane.f32.xlu0 %v90_v5 }
  0x86   :  { %v89_v13 = vpop.xlane.xlu0 %88  ;;  %v96_v17 = vpop.xlane.xlu2 %95 }
  0x87   :  { %v104_v14 = vmul.f32 %v103_v12, %v89_v13  ;;  %v106_v21 = vmul.f32 %v103_v12, %v96_v17 }
  0x89   :  { %v107_v15 = vsub.f32 %v78_v0, %v104_v14  ;;  %v1700_v23 = vsub.f32 %v80_v1, %v106_v21  ;;  %v82_v14 = vld [vmem:[%s2256_s26 + $0x8] sm:$0xff] }
  0x8b   :  { %v110_v16 = vmul.f32 %v107_v15, %v107_v15  ;;  %v112_v26 = vmul.f32 %v1700_v23, %v1700_v23 }
  0x8d   :  { %v113_v18 = vsel %vm86_vm0, %v110_v16, 0.0  ;;  %v119_v27 = vsel %vm93_vm1, %v112_v26, 0.0 }
  0x8e   :  { %114 = vadd.xlane.f32.xlu1 %v113_v18  ;;  %v92_v19 = vpop.xlane.xlu0 %91 }
  0x8f   :  { %v105_v20 = vmul.f32 %v103_v12, %v92_v19  ;;  %v83_v19 = vld [vmem:[%s2256_s26 + $0x10] sm:$0x3] }
  0x91   :  { %v108_v22 = vsub.f32 %v79_v4, %v105_v20 }
  0x93   :  { %v111_v24 = vmul.f32 %v108_v22, %v108_v22 }
  0x95   :  { %v116_v25 = vsel %vm86_vm0, %v111_v24, 0.0 }
  0x96   :  { %117 = vadd.xlane.f32.xlu1 %v116_v25  ;;  %v1553_v25 = vmov 32.0  }
  0x9e   :  { %120 = vadd.xlane.f32.xlu1 %v119_v27 }
 0x101   :  { %v115_v28 = vpop.xlane.xlu1 %114 }
 0x102   :  { %v122_v29 = vmul.f32 %v115_v28, %v103_v12 }
 0x104   :  { %v125_v31 = vadd.f32 1e-05, %v122_v29 }
 0x106   :  { %1504 = vrsqrt.f32 %v125_v31  ;;  %vm134_vm4 = vweird.f32 %v125_v31 }
 0x109   :  { %v118_v32 = vpop.xlane.xlu1 %117 }
 0x10a   :  { %v123_v33 = vmul.f32 %v118_v32, %v103_v12 }
 0x10c   :  { %v1505_v34 = vpop.eup %1504  ;;  %v126_v35 = vadd.f32 1e-05, %v123_v33 }
 0x10d   :  { %v129_v36 = vmul.f32 %v1505_v34, %v125_v31  ;;  %vm135_vm3 = vweird.f32 %v1505_v34 }
 0x10e   :  { %1506 = vrsqrt.f32 %v126_v35  ;;  %vm136_vm5 = vmor %vm134_vm4, %vm135_vm3  ;;  %vm144_vm7 = vweird.f32 %v126_v35 }
 0x10f   :  { %v130_v37 = vmul.f32 %v1505_v34, %v129_v36 }
 0x111   :  { %v131_v38 = vmul.f32 0.5, %v130_v37  ;;  %v121_v39 = vpop.xlane.xlu1 %120 }
 0x112   :  { %v124_v40 = vmul.f32 %v121_v39, %v103_v12 }
 0x113   :  { %v132_v41 = vsub.f32 1.5, %v131_v38 }
 0x114   :  { %v1507_v42 = vpop.eup %1506  ;;  %v127_v43 = vadd.f32 1e-05, %v124_v40 }
 0x115   :  { %v133_v44 = vmul.f32 %v1505_v34, %v132_v41  ;;  %v139_v45 = vmul.f32 %v1507_v42, %v126_v35  ;;  %vm145_vm6 = vweird.f32 %v1507_v42 }
 0x116   :  { %1508 = vrsqrt.f32 %v127_v43  ;;  %vm146_vm8 = vmor %vm144_vm7, %vm145_vm6  ;;  %vm154_vm9 = vweird.f32 %v127_v43 }
 0x117   :  { %v140_v46 = vmul.f32 %v1507_v42, %v139_v45  ;;  %v137_v47 = vsel %vm136_vm5, %v1505_v34, %v133_v44  ;;  %1510 = vrcp.f32 %v1553_v25 }
 0x118   :  { %v158_v51 = vmul.f32 %v137_v47, %v107_v15  ;;  %v1465_v47 = vld [vmem:[%s2257_s1 + $0x8] sm:$0xff] }
 0x119   :  { %v141_v48 = vmul.f32 0.5, %v140_v46  ;;  %333 = vmatpush.bf16.msra.mxu1 %v1465_v47 }
 0x11a   :  { %v164_v58 = vmul.f32 %v1492_v52, %v158_v51 }
 0x11b   :  { %v142_v49 = vsub.f32 1.5, %v141_v48  ;;  %v1467_v48 = vld [vmem:[%s2258_s7 + $0x8] sm:$0xff] }
 0x11c   :  { %v1509_v50 = vpop.eup %1508  ;;  %v170_v63 = vadd.f32 %v1493_v59, %v164_v58  ;;  %367 = vmatpush.bf16.msra.mxu2 %v1467_v48 }
 0x11d   :  { %v143_v53 = vmul.f32 %v1507_v42, %v142_v49  ;;  %v149_v54 = vmul.f32 %v1509_v50, %v127_v43  ;;  %vm155_vm10 = vweird.f32 %v1509_v50  ;;  %v1511_v26 = vpop.eup %1510  ;;  %v1469_v49 = vld [vmem:[%s2221_s14 + $0x8] sm:$0xff] }
 0x11e   :  { %vm156_vm11 = vmor %vm154_vm9, %vm155_vm10  ;;  %v228_v27 = vmul.f32 32.0, %v1511_v26  ;;  %vm232_vm14 = vweird.f32 %v1511_v26  ;;  %401 = vmatpush.bf16.msrb.mxu3 %v1469_v49  ;;  %vm483_vm9 = vcmask 1044480   ;;  %vm466_vm10 = vcmask 72704  }
 0x11f   :  { %v147_v55 = vsel %vm146_vm8, %v1507_v42, %v143_v53  ;;  %v150_v56 = vmul.f32 %v1509_v50, %v149_v54  ;;  %v1466_v53 = vld [vmem:[%s2258_s7] sm:$0xff]  ;;  %vm482_vm8 = vcmask 1043456  }
 0x120   :  { %v159_v57 = vmul.f32 %v147_v55, %v108_v22  ;;  %v229_v28 = vsub.f32 1.0, %v228_v27  ;;  %v1468_v54 = vld [vmem:[%s2221_s14] sm:$0xff]  ;;  %368 = vmatpush.bf16.msra.mxu2 %v1466_v53 }
 0x121   :  { %v151_v60 = vmul.f32 0.5, %v150_v56 }
 0x122   :  { %v165_v61 = vmul.f32 %v1492_v52, %v159_v57  ;;  %v230_v29 = vmul.f32 %v1511_v26, %v229_v28  ;;  %402 = vmatpush.bf16.msrb.mxu3 %v1468_v54 }
 0x123   :  { %v152_v62 = vsub.f32 1.5, %v151_v60 }
 0x124   :  { %v171_v0 = vadd.f32 %v1493_v59, %v165_v61  ;;  %v231_v30 = vadd.f32 %v1511_v26, %v230_v29 }
 0x125   :  { %v153_v1 = vmul.f32 %v1509_v50, %v152_v62 }
 0x126   :  { %v173_v2 = vpack.c.bf16 %v171_v0, %v170_v63  ;;  %v1742_v31 = vsel %vm232_vm14, %v1511_v26, %v231_v30 }
 0x127   :  { %v157_v3 = vsel %vm156_vm11, %v1509_v50, %v153_v1 }
 0x128   :  { %1330 = vmatmul.msk.bf16.vlgmr.msra.gmra.mxu0 %vm86_vm0, %v173_v2  ;;  %v160_v4 = vmul.f32 %v157_v3, %v1700_v23 }
 0x12a   :  { %v166_v5 = vmul.f32 %v1492_v52, %v160_v4  ;;  %v1464_v52 = vld [vmem:[%s2257_s1] sm:$0xff] }
 0x12b   :  { %334 = vmatpush.bf16.msra.mxu1 %v1464_v52  ;;  %v1818_v52 = vld [vmem:[%s2222_s3] sm:$0xff] }
 0x12c   :  { %v172_v6 = vadd.f32 %v1493_v59, %v166_v5 }
 0x12e   :  { %v174_v7 = vpack.c.bf16 %v172_v6, %v172_v6 }
 0x130   :  { %1331 = vmatmul.msk.bf16.vlgmr.msra.gmra.mxu3 %vm86_vm0, %v174_v7 }
 0x1a5   :  { %v202_v10 = vpop.f32.mrf.mxu0 }
 0x1a6   :  { %v203_v11 = vadd.f32 %v1494_v8, %v202_v10 }
 0x1a8   :  { %v1724_v12 = vadd.f32 %v203_v11, %v81_v9 }
 0x1aa   :  { %v217_v13 = vsel %vm216_vm12, %v1724_v12, 0.0 }
 0x1ab   :  { %218 = vadd.xlane.f32.xlu2 %v217_v13 }
 0x1ad   :  { %v204_v15 = vpop.f32.mrf.mxu0 }
 0x1ae   :  { %v205_v16 = vadd.f32 %v1494_v8, %v204_v15 }
 0x1b0   :  { %v1731_v17 = vadd.f32 %v205_v16, %v82_v14  ;;  %v1495_v14 = vld [vmem:[%s2259_s28] ss:$0 sm:$0xff] }
 0x1b2   :  { %v220_v18 = vsel %vm216_vm12, %v1731_v17, 0.0 }
 0x1b3   :  { %221 = vadd.xlane.f32.xlu0 %v220_v18  ;;  %v207_v20 = vpop.f32.mrf.mxu3 }
 0x1b4   :  { %v208_v21 = vadd.f32 %v1494_v8, %v207_v20 }
 0x1b6   :  { %v1738_v22 = vadd.f32 %v208_v21, %v83_v19 }
 0x1b8   :  { %v224_v23 = vsel %vm223_vm13, %v1738_v22, 0.0 }
 0x1b9   :  { %225 = vadd.xlane.f32.xlu1 %v224_v23  ;;  %v1496_v23 = vld [vmem:[%s2260_s0] ss:$0 sm:$0xff] }
 0x1bb   :  { %v209_v24 = vpop.f32.mrf.mxu3 }
 0x21e   :  { %v219_v32 = vpop.xlane.xlu2 %218 }
 0x21f   :  { %v234_v33 = vmul.f32 %v1742_v31, %v219_v32 }
 0x221   :  { %v1746_v34 = vsub.f32 %v1724_v12, %v234_v33 }
 0x223   :  { %v240_v35 = vmul.f32 %v1746_v34, %v1746_v34 }
 0x225   :  { %v243_v36 = vsel %vm216_vm12, %v240_v35, 0.0 }
 0x226   :  { %v222_v37 = vpop.xlane.xlu0 %221  ;;  %244 = vadd.xlane.f32.xlu2 %v243_v36 }
 0x227   :  { %v235_v38 = vmul.f32 %v1742_v31, %v222_v37 }
 0x229   :  { %v1753_v39 = vsub.f32 %v1731_v17, %v235_v38 }
 0x22b   :  { %v241_v40 = vmul.f32 %v1753_v39, %v1753_v39 }
 0x22c   :  { %v226_v41 = vpop.xlane.xlu1 %225 }
 0x22d   :  { %v236_v42 = vmul.f32 %v1742_v31, %v226_v41  ;;  %v246_v43 = vsel %vm216_vm12, %v241_v40, 0.0  ;;  %v1554_v41 = vmov 65535  }
 0x22e   :  { %247 = vadd.xlane.f32.xlu0 %v246_v43 }
 0x22f   :  { %v1760_v44 = vsub.f32 %v1738_v22, %v236_v42  ;;  %v484_v42 = vsel %vm482_vm8, 4294967295, %v1554_v41 }
 0x231   :  { %v242_v45 = vmul.f32 %v1760_v44, %v1760_v44 }
 0x233   :  { %v249_v46 = vsel %vm223_vm13, %v242_v45, 0.0 }
 0x234   :  { %250 = vadd.xlane.f32.xlu2 %v249_v46 }
 0x299   :  { %v245_v50 = vpop.xlane.xlu2 %244 }
 0x29a   :  { %v252_v51 = vmul.f32 %v245_v50, %v1742_v31 }
 0x29c   :  { %v255_v55 = vadd.f32 1e-05, %v252_v51 }
 0x29e   :  { %1512 = vrsqrt.f32 %v255_v55  ;;  %vm264_vm0 = vweird.f32 %v255_v55 }
 0x2a1   :  { %v248_v56 = vpop.xlane.xlu0 %247 }
 0x2a2   :  { %v253_v57 = vmul.f32 %v248_v56, %v1742_v31 }
 0x2a4   :  { %v1513_v58 = vpop.eup %1512  ;;  %v256_v59 = vadd.f32 1e-05, %v253_v57 }
 0x2a5   :  { %v259_v60 = vmul.f32 %v1513_v58, %v255_v55  ;;  %vm265_vm15 = vweird.f32 %v1513_v58 }
 0x2a6   :  { %1514 = vrsqrt.f32 %v256_v59  ;;  %vm266_vm1 = vmor %vm264_vm0, %vm265_vm15  ;;  %vm274_vm3 = vweird.f32 %v256_v59  ;;  %vm625_vm15 = vcmask 588800   ;;  %vm627_vm0 = vcmask 581632  }
 0x2a7   :  { %v260_v61 = vmul.f32 %v1513_v58, %v259_v60  ;;  %v251_v62 = vpop.xlane.xlu2 %250 }
 0x2a8   :  { %v254_v63 = vmul.f32 %v251_v62, %v1742_v31 }
 0x2a9   :  { %v261_v0 = vmul.f32 0.5, %v260_v61 }
 0x2aa   :  { %v257_v1 = vadd.f32 1e-05, %v254_v63 }
 0x2ab   :  { %v262_v2 = vsub.f32 1.5, %v261_v0 }
 0x2ac   :  { %v1515_v3 = vpop.eup %1514  ;;  %1516 = vrsqrt.f32 %v257_v1  ;;  %vm284_vm6 = vweird.f32 %v257_v1 }
 0x2ad   :  { %v263_v4 = vmul.f32 %v1513_v58, %v262_v2  ;;  %v269_v5 = vmul.f32 %v1515_v3, %v256_v59  ;;  %vm275_vm2 = vweird.f32 %v1515_v3 }
 0x2ae   :  { %vm276_vm4 = vmor %vm274_vm3, %vm275_vm2  ;;  %vm943_vm3 = vcmask 1040384  }
 0x2af   :  { %v270_v6 = vmul.f32 %v1515_v3, %v269_v5  ;;  %v267_v7 = vsel %vm266_vm1, %v1513_v58, %v263_v4 }
 0x2b0   :  { %v288_v13 = vmul.f32 %v267_v7, %v1746_v34  ;;  %v1844_v7 = vld [vmem:[%s2222_s3 + $0x10] sm:$0xff] }
 0x2b1   :  { %v271_v8 = vmul.f32 0.5, %v270_v6  ;;  %v1835_v6 = vld [vmem:[%s2222_s3 + $0x8] sm:$0xff] }
 0x2b2   :  { %v1517_v9 = vpop.eup %1516  ;;  %v294_v21 = vmul.f32 %v1495_v14, %v288_v13 }
 0x2b3   :  { %v272_v10 = vsub.f32 1.5, %v271_v8  ;;  %v279_v11 = vmul.f32 %v1517_v9, %v257_v1  ;;  %vm285_vm5 = vweird.f32 %v1517_v9  ;;  %v1853_v8 = vld [vmem:[%s2222_s3 + $0x18] sm:$0xff] }
 0x2b4   :  { %v300_v27 = vadd.f32 %v1496_v23, %v294_v21  ;;  %vm286_vm7 = vmor %vm284_vm6, %vm285_vm5 }
 0x2b5   :  { %v273_v15 = vmul.f32 %v1515_v3, %v272_v10  ;;  %v280_v16 = vmul.f32 %v1517_v9, %v279_v11 }
 0x2b7   :  { %v277_v18 = vsel %vm276_vm4, %v1515_v3, %v273_v15  ;;  %v281_v19 = vmul.f32 0.5, %v280_v16  ;;  %v1876_v15 = vld [vmem:[%s2223_s4 + $0x8] sm:$0xff] }
 0x2b8   :  { %v289_v20 = vmul.f32 %v277_v18, %v1753_v39 }
 0x2b9   :  { %v282_v24 = vsub.f32 1.5, %v281_v19 }
 0x2ba   :  { %v295_v25 = vmul.f32 %v1495_v14, %v289_v20 }
 0x2bb   :  { %v283_v26 = vmul.f32 %v1517_v9, %v282_v24  ;;  %v1888_v24 = vld [vmem:[%s2223_s4 + $0x18] sm:$0xff] }
 0x2bc   :  { %v301_v28 = vadd.f32 %v1496_v23, %v295_v25 }
 0x2bd   :  { %v287_v30 = vsel %vm286_vm7, %v1517_v9, %v283_v26  ;;  %v421_v9 = vld [vmem:[%s2222_s3 + $0x20] sm:$0xf] }
 0x2be   :  { %v303_v29 = vpack.c.bf16 %v301_v28, %v300_v27  ;;  %v290_v32 = vmul.f32 %v287_v30, %v1760_v44  ;;  %v1808_v44 = vsel %vm483_vm9, %v484_v42, 0  ;;  %v460_v10 = vunpack.c.l.b16 %v421_v9  ;;  %v1906_v42 = vld [vmem:[%s2223_s4 + $0x30] sm:$0xff] }
 0x2c0   :  { %1340 = vmatmul.msk.bf16.vlgmr.msra.gmra.mxu1 %vm216_vm12, %v303_v29  ;;  %1350 = vmatmul.msk.bf16.vlgmr.msra.gmra.mxu2 %vm216_vm12, %v303_v29  ;;  %v296_v33 = vmul.f32 %v1495_v14, %v290_v32  ;;  %v1862_v11 = vpack.c.b16 %v460_v10, %v460_v10  ;;  %v1871_v14 = vld [vmem:[%s2223_s4] sm:$0xff] }
 0x2c1   :  { %1360 = vmatmul.msk.bf16.vlgmr.msrb.gmra.mxu3 %vm216_vm12, %v303_v29 }
 0x2c2   :  { %v302_v34 = vadd.f32 %v1496_v23, %v296_v33  ;;  %v1883_v23 = vld [vmem:[%s2223_s4 + $0x10] sm:$0xff] }
 0x2c4   :  { %v304_v35 = vpack.c.bf16 %v302_v34, %v302_v34  ;;  %v1895_v34 = vld [vmem:[%s2223_s4 + $0x40] sm:$0xff] }
 0x2d0   :  { %1341 = vmatmul.msk.bf16.gmra.mxu1 %vm216_vm12, %v304_v35  ;;  %1351 = vmatmul.msk.bf16.gmra.mxu2 %vm216_vm12, %v304_v35 }
 0x2d1   :  { %1361 = vmatmul.msk.bf16.gmra.mxu3 %vm216_vm12, %v304_v35 }
 0x33d   :  { %v1801_v36 = vpop.f32.mrf.mxu1 }
 0x343   :  { %v370_v37 = vpop.f32.mrf.mxu2 }
 0x344   :  { %v404_v38 = vpop.f32.mrf.mxu3 }
 0x345   :  { %v1803_v39 = vpop.f32.mrf.mxu1 }
 0x346   :  { %v440_v40 = vpack.c.bf16 %v1803_v39, %v1801_v36  ;;  %v618_v36 = vld [vmem:[%s2224_s2] sm:$0x1] }
 0x347   :  { %vm619_vm11 = vcmp.gt.f32.partialorder %v618_v36, 0.0 }
 0x34b   :  { %v372_v43 = vpop.f32.mrf.mxu2 }
 0x34c   :  { %v441_v45 = vpack.c.bf16 %v372_v43, %v370_v37  ;;  %v406_v46 = vpop.f32.mrf.mxu3 }
 0x34d   :  { %v442_v47 = vpack.c.bf16 %v406_v46, %v404_v38  ;;  %v341_v48 = vpop.f32.mrf.mxu1  ;;  %v1901_v38 = vld [vmem:[%s2223_s4 + $0x38] sm:$0xff] }
 0x34e   :  { %v1811_v49 = vpack.c.bf16 %v341_v48, %v1803_v39  ;;  %v487_v50 = vand.u32 %v1808_v44, %v441_v45  ;;  %v1555_v39 = vmov 0  }
 0x34f   :  { %v537_v51 = vand.u32 %v1808_v44, %v442_v47 }
 0x350   :  { %496 = vmatpush.bf16.msrb.mxu0 %v487_v50  ;;  %v1914_v50 = vld [vmem:[%s2223_s4 + $0x28] sm:$0xff] }
 0x351   :  { %546 = vmatpush.bf16.msrb.mxu1 %v537_v51  ;;  %v1919_v51 = vld [vmem:[%s2223_s4 + $0x20] sm:$0xff] }
 0x353   :  { %v375_v53 = vpop.f32.mrf.mxu2  ;;  %1378 = vmatmul.msk.bf16.vlgmr.msrb.gmra.mxu0 %vm466_vm10, %v1818_v52 }
 0x354   :  { %v717_v54 = vpack.c.bf16 %v375_v53, %v372_v43  ;;  %v409_v55 = vpop.f32.mrf.mxu3  ;;  %1383 = vmatmul.msk.bf16.vlgmr.msrb.gmra.mxu1 %vm466_vm10, %v1818_v52 }
 0x355   :  { %v718_v56 = vpack.c.bf16 %v409_v55, %v406_v46  ;;  %v343_v57 = vpop.f32.mrf.mxu1 }
 0x356   :  { %v722_v58 = vshll.u32 %v717_v54, 16  ;;  %v720_v60 = vshrl.u32 %v717_v54, 16 }
 0x357   :  { %v779_v59 = vshll.u32 %v718_v56, 16  ;;  %v777_v62 = vshrl.u32 %v718_v56, 16 }
 0x358   :  { %v724_v61 = vrot.slane %v722_v58, 1 }
 0x359   :  { %v781_v63 = vrot.slane %v779_v59, 1 }
 0x35a   :  { %v1824_v0 = vor.u32 %v724_v61, %v720_v60 }
 0x35b   :  { %v1826_v1 = vor.u32 %v781_v63, %v777_v62  ;;  %v377_v2 = vpop.f32.mrf.mxu2 }
 0x35c   :  { %v727_v3 = vand.u32 %v1824_v0, %v1808_v44  ;;  %v411_v4 = vpop.f32.mrf.mxu3 }
 0x35d   :  { %v784_v5 = vand.u32 %v1826_v1, %v1808_v44 }
 0x363   :  { %1379 = vmatmul.msk.bf16.gmra.mxu0 %vm466_vm10, %v1835_v6 }
 0x364   :  { %1384 = vmatmul.msk.bf16.gmra.mxu1 %vm466_vm10, %v1835_v6 }
 0x373   :  { %1380 = vmatmul.msk.bf16.gmra.mxu0 %vm466_vm10, %v1844_v7 }
 0x374   :  { %1385 = vmatmul.msk.bf16.gmra.mxu1 %vm466_vm10, %v1844_v7 }
 0x383   :  { %1381 = vmatmul.msk.bf16.gmra.mxu0 %vm466_vm10, %v1853_v8 }
 0x384   :  { %1386 = vmatmul.msk.bf16.gmra.mxu1 %vm466_vm10, %v1853_v8 }
 0x393   :  { %1382 = vmatmul.msk.bf16.gmra.mxu0 %vm466_vm10, %v1862_v11 }
 0x394   :  { %1387 = vmatmul.msk.bf16.gmra.mxu1 %vm466_vm10, %v1862_v11 }
 0x3d0   :  { %v498_v13 = vpop.f32.mrf.mxu0 }
 0x3d1   :  { %v522_v18 = vmul.f32 %v498_v13, %v1871_v14  ;;  %v548_v9 = vpop.f32.mrf.mxu1 }
 0x3d8   :  { %v500_v16 = vpop.f32.mrf.mxu0 }
 0x3d9   :  { %v523_v19 = vmul.f32 %v500_v16, %v1876_v15 }
 0x3db   :  { %v531_v20 = vpack.c.bf16 %v523_v19, %v522_v18  ;;  %v1970_v18 = vmul.f32 %v548_v9, %v1871_v14 }
 0x3dd   :  { %v590_v59 = vsel %vm216_vm12, %v531_v20, 0  ;;  %v550_v20 = vpop.f32.mrf.mxu1 }
 0x3e0   :  { %v503_v21 = vpop.f32.mrf.mxu0 }
 0x3e1   :  { %v524_v26 = vmul.f32 %v503_v21, %v1883_v23  ;;  %v1975_v21 = vmul.f32 %v550_v20, %v1876_v15 }
 0x3e8   :  { %v505_v25 = vpop.f32.mrf.mxu0 }
 0x3e9   :  { %v525_v27 = vmul.f32 %v505_v25, %v1888_v24  ;;  %v581_v25 = vpack.c.bf16 %v1975_v21, %v1970_v18 }
 0x3eb   :  { %v532_v28 = vpack.c.bf16 %v525_v27, %v524_v26  ;;  %v553_v27 = vpop.f32.mrf.mxu1 }
 0x3ed   :  { %v593_v58 = vsel %vm216_vm12, %v532_v28, 0 }
 0x3f0   :  { %v508_v29 = vpop.f32.mrf.mxu0 }
 0x3f1   :  { %v526_v55 = vmul.f32 %v508_v29, %v1919_v51 }
 0x3f8   :  { %v510_v30 = vpop.f32.mrf.mxu0 }
 0x3f9   :  { %v527_v53 = vmul.f32 %v510_v30, %v1914_v50 }
 0x3fb   :  { %v533_v56 = vpack.c.bf16 %v527_v53, %v526_v55 }
 0x3fd   :  { %v596_v57 = vsel %vm216_vm12, %v533_v56, 0  ;;  %v1477_v56 = vld [vmem:[%s2226_s5 + $0x18] sm:$0xff] }
 0x400   :  { %v513_v32 = vpop.f32.mrf.mxu0 }
 0x401   :  { %v528_v46 = vmul.f32 %v513_v32, %v1906_v42 }
 0x408   :  { %v515_v33 = vpop.f32.mrf.mxu0 }
 0x409   :  { %v529_v43 = vmul.f32 %v515_v33, %v1901_v38  ;;  %v555_v33 = vpop.f32.mrf.mxu1 }
 0x40b   :  { %v534_v48 = vpack.c.bf16 %v529_v43, %v528_v46 }
 0x40d   :  { %v599_v54 = vsel %vm216_vm12, %v534_v48, 0 }
 0x410   :  { %v518_v35 = vpop.f32.mrf.mxu0 }
 0x411   :  { %v530_v37 = vmul.f32 %v518_v35, %v1895_v34 }
 0x413   :  { %v535_v41 = vpack.c.bf16 %v530_v37, %v530_v37  ;;  %v558_v37 = vpop.f32.mrf.mxu1 }
 0x415   :  { %v602_v45 = vsel %vm216_vm12, %v535_v41, 0 }
 0x416   :  { %607 = vmatpush.bf16.xpose.msrb.mxu2 %v602_v45 }
 0x418   :  { %v520_v47 = vpop.f32.mrf.mxu0 }
 0x419   :  { %v439_v47 = vld [vmem:[%s2226_s5 + $0x20] sm:$0xf] }
 0x41a   :  { %v659_v48 = vunpack.c.l.b16 %v439_v47  ;;  %v1474_v47 = vld [vmem:[%s2226_s5] sm:$0xff] }
 0x41b   :  { %v560_v43 = vpop.f32.mrf.mxu1 }
 0x41e   :  { %608 = vmatpush.bf16.xpose.msrb.mxu2 %v599_v54  ;;  %v664_v54 = vpack.c.b16 %v659_v48, %v659_v48 }
 0x420   :  { %v673_v55 = vsel %vm482_vm8, %v664_v54, 0 }
 0x421   :  { %678 = vmatpush.bf16.msra.mxu3 %v673_v55  ;;  %902 = vmatpush.bf16.msra.mxu1 %v673_v55 }
 0x423   :  { %v563_v46 = vpop.f32.mrf.mxu1 }
 0x425   :  { %679 = vmatpush.bf16.msra.mxu3 %v1477_v56  ;;  %903 = vmatpush.bf16.msra.mxu1 %v1477_v56 }
 0x426   :  { %609 = vmatpush.bf16.xpose.msrb.mxu2 %v596_v57 }
 0x42b   :  { %v565_v57 = vpop.f32.mrf.mxu1 }
 0x42c   :  { %v579_v20 = vmul.f32 %v565_v57, %v1901_v38 }
 0x42e   :  { %610 = vmatpush.bf16.xpose.msrb.mxu2 %v593_v58  ;;  %v1476_v58 = vld [vmem:[%s2226_s5 + $0x10] sm:$0xff] }
 0x42f   :  { %680 = vmatpush.bf16.msra.mxu3 %v1476_v58  ;;  %904 = vmatpush.bf16.msra.mxu1 %v1476_v58  ;;  %v574_v58 = vmul.f32 %v553_v27, %v1883_v23 }
 0x436   :  { %611 = vmatpush.bf16.xpose.msrb.mxu2 %v590_v59 }
 0x43d   :  { %1388 = vmatmul.msk.bf16.vlgmr.msrb.gmra.mxu2 %vm216_vm12, %v440_v40  ;;  %v620_v40 = vsel %vm619_vm11, 1, %v1555_v39 }
 0x43e   :  { %736 = vmatpush.bf16.msra.mxu2 %v727_v3  ;;  %v621_v60 = vperm.slane %v620_v40, 0 }
 0x440   :  { %vm622_vm14 = vcmp.eq.s32.totalorder %v621_v60, 1  ;;  %v1475_v60 = vld [vmem:[%s2226_s5 + $0x8] sm:$0xff] }
 0x441   :  { %681 = vmatpush.bf16.msra.mxu3 %v1475_v60  ;;  %905 = vmatpush.bf16.msra.mxu1 %v1475_v60 }
 0x445   :  { %682 = vmatpush.bf16.msra.mxu3 %v1474_v47  ;;  %906 = vmatpush.bf16.msra.mxu1 %v1474_v47 }
 0x44d   :  { %1407 = vmatmul.msk.bf16.vlgmr.msra.gmra.mxu2 %vm466_vm10, %v1818_v52 }
 0x45d   :  { %1408 = vmatmul.msk.bf16.gmra.mxu2 %vm466_vm10, %v1835_v6 }
 0x46d   :  { %1409 = vmatmul.msk.bf16.gmra.mxu2 %vm466_vm10, %v1844_v7 }
 0x47d   :  { %1410 = vmatmul.msk.bf16.gmra.mxu2 %vm466_vm10, %v1853_v8 }
 0x48d   :  { %1411 = vmatmul.msk.bf16.gmra.mxu2 %vm466_vm10, %v1862_v11 }
 0x4c0   :  { %v613_v61 = vpop.f32.mrf.mxu2 }
 0x4c1   :  { %v1945_v62 = vsel %vm622_vm14, -1e+30, %v613_v61 }
 0x4c2   :  { %626 = vst.msk [vmem:[%s2225_s25] sm:$0xff] %vm625_vm15, %v1945_v62  ;;  %v629_v63 = vsel %vm625_vm15, %v1945_v62, -inf }
 0x4c3   :  { %630 = vmax.xlane.f32.xlu0 %v629_v63 }
 0x4c8   :  { %v615_v0 = vpop.f32.mrf.mxu2 }
 0x4c9   :  { %v1954_v2 = vsel %vm622_vm14, -1e+30, %v615_v0  ;;  %v568_v0 = vpop.f32.mrf.mxu1 }
 0x4ca   :  { %628 = vst.msk [vmem:[%s2225_s25 + $0x8] sm:$0x1] %vm627_vm0, %v1954_v2  ;;  %v632_v3 = vsel %vm627_vm0, %v1954_v2, -inf }
 0x4cb   :  { %633 = vmax.xlane.f32.xlu1 %v632_v3  ;;  %v580_v3 = vmul.f32 %v568_v0, %v1895_v34 }
 0x4d0   :  { %v738_v4 = vpop.f32.mrf.mxu2 }
 0x4d1   :  { %v1964_v13 = vmul.f32 %v738_v4, %v1871_v14  ;;  %v570_v56 = vpop.f32.mrf.mxu1 }
 0x4d8   :  { %v740_v10 = vpop.f32.mrf.mxu2 }
 0x4d9   :  { %v1967_v16 = vmul.f32 %v740_v10, %v1876_v15  ;;  %v578_v10 = vmul.f32 %v563_v46, %v1906_v42 }
 0x4db   :  { %v771_v19 = vpack.c.bf16 %v1967_v16, %v1964_v13  ;;  %v584_v54 = vpack.c.bf16 %v579_v20, %v578_v10 }
 0x4e0   :  { %v743_v26 = vpop.f32.mrf.mxu2 }
 0x4e1   :  { %v1980_v29 = vmul.f32 %v743_v26, %v1883_v23  ;;  %v585_v26 = vpack.c.bf16 %v580_v3, %v580_v3 }
 0x4e3   :  { %v700_v48 = vsel %vm482_vm8, %v585_v26, 0 }
 0x4e4   :  { %705 = vmatpush.bf16.msrb.mxu3 %v700_v48 }
 0x4e8   :  { %v745_v28 = vpop.f32.mrf.mxu2  ;;  %706 = vmatpush.bf16.msrb.mxu3 %v584_v54 }
 0x4e9   :  { %v1983_v30 = vmul.f32 %v745_v28, %v1888_v24 }
 0x4eb   :  { %v772_v32 = vpack.c.bf16 %v1983_v30, %v1980_v29 }
 0x4ed   :  { %v847_v27 = vsel %vm216_vm12, %v772_v32, 0 }
 0x4f0   :  { %v748_v35 = vpop.f32.mrf.mxu2 }
 0x4f1   :  { %v766_v57 = vmul.f32 %v748_v35, %v1919_v51  ;;  %v844_v35 = vsel %vm216_vm12, %v771_v19, 0 }
 0x4f8   :  { %v750_v41 = vpop.f32.mrf.mxu2 }
 0x4f9   :  { %v767_v46 = vmul.f32 %v750_v41, %v1914_v50 }
 0x500   :  { %v753_v45 = vpop.f32.mrf.mxu2 }
 0x501   :  { %v768_v4 = vmul.f32 %v753_v45, %v1906_v42  ;;  %v577_v45 = vmul.f32 %v560_v43, %v1914_v50 }
 0x508   :  { %v755_v53 = vpop.f32.mrf.mxu2 }
 0x509   :  { %v769_v61 = vmul.f32 %v755_v53, %v1901_v38  ;;  %v576_v53 = vmul.f32 %v558_v37, %v1919_v51 }
 0x50b   :  { %v774_v28 = vpack.c.bf16 %v769_v61, %v768_v4  ;;  %v834_v61 = vshrl.u32 %v1811_v49, 16 }
 0x50d   :  { %v853_v55 = vsel %vm216_vm12, %v774_v28, 0 }
 0x510   :  { %v758_v59 = vpop.f32.mrf.mxu2 }
 0x511   :  { %v770_v36 = vmul.f32 %v758_v59, %v1895_v34  ;;  %v575_v59 = vmul.f32 %v555_v33, %v1888_v24  ;;  %v836_v33 = vshll.u32 %v1811_v49, 16  ;;  %v1418_v49 = vld [vmem:[%s2224_s2 + $0x1] sm:$0x1] }
 0x512   :  { %vm874_vm1 = vcmp.gt.f32.partialorder %v1418_v49, 0.0 }
 0x513   :  { %v775_v40 = vpack.c.bf16 %v770_v36, %v770_v36  ;;  %v583_v36 = vpack.c.bf16 %v577_v45, %v576_v53  ;;  %v582_v37 = vpack.c.bf16 %v575_v59, %v574_v58  ;;  %v838_v41 = vrot.slane %v836_v33, 1 }
 0x515   :  { %v856_v63 = vsel %vm216_vm12, %v775_v40, 0  ;;  %v773_v40 = vpack.c.bf16 %v767_v46, %v766_v57  ;;  %707 = vmatpush.bf16.msrb.mxu3 %v583_v36  ;;  %v839_v21 = vor.u32 %v838_v41, %v834_v61 }
 0x516   :  { %861 = vmatpush.bf16.xpose.msra.mxu0 %v856_v63 }
 0x517   :  { %v850_v43 = vsel %vm216_vm12, %v773_v40, 0 }
 0x518   :  { %v760_v9 = vpop.f32.mrf.mxu2 }
 0x519   :  { %708 = vmatpush.bf16.msrb.mxu3 %v582_v37 }
 0x51d   :  { %709 = vmatpush.bf16.msrb.mxu3 %v581_v25 }
 0x51e   :  { %862 = vmatpush.bf16.xpose.msra.mxu0 %v853_v55 }
 0x526   :  { %863 = vmatpush.bf16.xpose.msra.mxu0 %v850_v43 }
 0x52e   :  { %864 = vmatpush.bf16.xpose.msra.mxu0 %v847_v27 }
 0x536   :  { %865 = vmatpush.bf16.xpose.msra.mxu0 %v844_v35  ;;  %v631_v60 = vpop.xlane.xlu0 %630 }
 0x537   :  { %v635_v18 = vsub.f32 %v1945_v62, %v631_v60  ;;  %v875_v62 = vsel %vm874_vm1, 1, %v1555_v39  ;;  %v1479_v60 = vld [vmem:[%s2228_s15 + $0x8] sm:$0xff] }
 0x538   :  { %984 = vmatpush.bf16.msrb.mxu1 %v1479_v60 }
 0x539   :  { %v637_v25 = vmul.f32 1.442695, %v635_v18 }
 0x53b   :  { %1518 = vpow2.f32 %v637_v25 }
 0x53d   :  { %1417 = vmatmul.msk.bf16.vlgmr.msra.gmra.mxu0 %vm216_vm12, %v839_v21 }
 0x53e   :  { %v634_v29 = vpop.xlane.xlu1 %633 }
 0x53f   :  { %v636_v30 = vsub.f32 %v1954_v2, %v634_v29  ;;  %v876_v2 = vperm.slane %v875_v62, 0 }
 0x541   :  { %v639_v32 = vmul.f32 1.442695, %v636_v30  ;;  %v1519_v13 = vpop.eup %1518  ;;  %vm877_vm2 = vcmp.eq.s32.totalorder %v876_v2, 1 }
 0x543   :  { %1520 = vpow2.f32 %v639_v32 }
 0x549   :  { %v1521_v16 = vpop.eup %1520 }
 0x54a   :  { %v641_v19 = vpack.c.bf16 %v1521_v16, %v1519_v13 }
 0x54c   :  { %1405 = vmatmul.msk.bf16.vlgmr.msra.gmra.mxu3 %vm625_vm15, %v641_v19 }
 0x54d   :  { %793 = vmatpush.bf16.msra.mxu3 %v784_v5 }
 0x5ba   :  { %v867_v63 = vpop.f32.mrf.mxu0 }
 0x5bb   :  { %v878_v0 = vsel %vm877_vm2, -1e+30, %v867_v63 }
 0x5bc   :  { %1419 = vst.msk [vmem:[%s2225_s25 + $0x10] sm:$0xff] %vm625_vm15, %v878_v0  ;;  %v883_v3 = vsel %vm625_vm15, %v878_v0, -inf }
 0x5bd   :  { %884 = vmax.xlane.f32.xlu2 %v883_v3 }
 0x5c2   :  { %v869_v44 = vpop.f32.mrf.mxu0 }
 0x5c3   :  { %v879_v1 = vsel %vm877_vm2, -1e+30, %v869_v44 }
 0x5c4   :  { %1420 = vst.msk [vmem:[%s2225_s25 + $0x18] sm:$0x1] %vm627_vm0, %v879_v1  ;;  %v886_v5 = vsel %vm627_vm0, %v879_v1, -inf }
 0x5c5   :  { %887 = vmax.xlane.f32.xlu0 %v886_v5 }
 0x5cf   :  { %v684_v39 = vpop.f32.mrf.mxu3 }
 0x5d0   :  { %1522 = vrcp.f32 %v684_v39  ;;  %v1497_v39 = vld [vmem:[%s2229_s16] ss:$0 sm:$0xff] }
 0x5d6   :  { %v1523_v4 = vpop.eup %1522 }
 0x5d7   :  { %v691_v9 = vmul.f32 %v1523_v4, %v1519_v13  ;;  %v686_v10 = vpop.f32.mrf.mxu3 }
 0x5d8   :  { %1524 = vrcp.f32 %v686_v10 }
 0x5d9   :  { %693 = vst.msk [vmem:[%s2227_s24] sm:$0xff] %vm625_vm15, %v691_v9 }
 0x5de   :  { %v1525_v20 = vpop.eup %1524 }
 0x5df   :  { %v692_v26 = vmul.f32 %v1525_v20, %v1521_v16 }
 0x5e1   :  { %694 = vst.msk [vmem:[%s2227_s24 + $0x8] sm:$0x1] %vm627_vm0, %v692_v26  ;;  %v695_v28 = vpack.c.bf16 %v692_v26, %v691_v9 }
 0x5e3   :  { %1406 = vmatmul.msk.bf16.vlgmr.msrb.gmra.mxu3 %vm625_vm15, %v695_v28 }
 0x5f3   :  { %1412 = vmatmul.msk.bf16.vlgmr.msra.gmra.mxu3 %vm466_vm10, %v1818_v52 }
 0x603   :  { %1413 = vmatmul.msk.bf16.gmra.mxu3 %vm466_vm10, %v1835_v6 }
 0x613   :  { %1414 = vmatmul.msk.bf16.gmra.mxu3 %vm466_vm10, %v1844_v7 }
 0x623   :  { %1415 = vmatmul.msk.bf16.gmra.mxu3 %vm466_vm10, %v1853_v8 }
 0x630   :  { %v885_v47 = vpop.xlane.xlu2 %884 }
 0x631   :  { %v889_v48 = vsub.f32 %v878_v0, %v885_v47 }
 0x633   :  { %1416 = vmatmul.msk.bf16.gmra.mxu3 %vm466_vm10, %v1862_v11  ;;  %v891_v53 = vmul.f32 1.442695, %v889_v48 }
 0x635   :  { %1526 = vpow2.f32 %v891_v53 }
 0x638   :  { %v888_v45 = vpop.xlane.xlu0 %887 }
 0x639   :  { %v890_v54 = vsub.f32 %v879_v1, %v888_v45 }
 0x63b   :  { %v893_v46 = vmul.f32 1.442695, %v890_v54  ;;  %v1527_v52 = vpop.eup %1526 }
 0x63d   :  { %1528 = vpow2.f32 %v893_v46 }
 0x643   :  { %v1529_v55 = vpop.eup %1528 }
 0x644   :  { %v895_v6 = vpack.c.bf16 %v1529_v55, %v1527_v52 }
 0x646   :  { %1421 = vmatmul.msk.bf16.vlgmr.msra.gmra.mxu1 %vm625_vm15, %v895_v6 }
 0x666   :  { %v711_v7 = vpop.f32.mrf.mxu3 }
 0x66e   :  { %v713_v56 = vpop.f32.mrf.mxu3 }
 0x676   :  { %v795_v57 = vpop.f32.mrf.mxu3 }
 0x677   :  { %v819_v8 = vmul.f32 %v795_v57, %v1871_v14 }
 0x67e   :  { %v797_v58 = vpop.f32.mrf.mxu3 }
 0x67f   :  { %v820_v11 = vmul.f32 %v797_v58, %v1876_v15 }
 0x681   :  { %v828_v59 = vpack.c.bf16 %v820_v11, %v819_v8 }
 0x686   :  { %v800_v36 = vpop.f32.mrf.mxu3 }
 0x68e   :  { %v802_v40 = vpop.f32.mrf.mxu3 }
 0x68f   :  { %v822_v32 = vmul.f32 %v802_v40, %v1888_v24 }
 0x696   :  { %v805_v37 = vpop.f32.mrf.mxu3 }
 0x697   :  { %v823_v21 = vmul.f32 %v805_v37, %v1919_v51  ;;  %v1478_v51 = vld [vmem:[%s2228_s15] sm:$0xff] }
 0x698   :  { %985 = vmatpush.bf16.msrb.mxu1 %v1478_v51 }
 0x69e   :  { %v807_v43 = vpop.f32.mrf.mxu3 }
 0x69f   :  { %v824_v25 = vmul.f32 %v807_v43, %v1914_v50 }
 0x6a1   :  { %v830_v13 = vpack.c.bf16 %v824_v25, %v823_v21 }
 0x6a6   :  { %v810_v27 = vpop.f32.mrf.mxu3 }
 0x6a7   :  { %v825_v14 = vmul.f32 %v810_v27, %v1906_v42 }
 0x6ae   :  { %v812_v33 = vpop.f32.mrf.mxu3 }
 0x6af   :  { %v826_v15 = vmul.f32 %v812_v33, %v1901_v38 }
 0x6b1   :  { %v831_v29 = vpack.c.bf16 %v826_v15, %v825_v14 }
 0x6b6   :  { %v815_v35 = vpop.f32.mrf.mxu3 }
 0x6b7   :  { %v827_v41 = vmul.f32 %v815_v35, %v1895_v34  ;;  %v821_v34 = vmul.f32 %v800_v36, %v1883_v23 }
 0x6b9   :  { %v832_v61 = vpack.c.bf16 %v827_v41, %v827_v41  ;;  %v829_v42 = vpack.c.bf16 %v822_v32, %v821_v34  ;;  %v1480_v41 = vld [vmem:[%s2232_s19] sm:$0xff] }
 0x6bb   :  { %v925_v18 = vsel %vm482_vm8, %v832_v61, 0 }
 0x6bc   :  { %930 = vmatpush.bf16.msrb.mxu0 %v925_v18 }
 0x6be   :  { %v817_v30 = vpop.f32.mrf.mxu3 }
 0x6c0   :  { %931 = vmatpush.bf16.msrb.mxu0 %v831_v29 }
 0x6c3   :  { %v908_v16 = vpop.f32.mrf.mxu1 }
 0x6c4   :  { %1530 = vrcp.f32 %v908_v16  ;;  %932 = vmatpush.bf16.msrb.mxu0 %v830_v13 }
 0x6c8   :  { %933 = vmatpush.bf16.msrb.mxu0 %v829_v42 }
 0x6ca   :  { %v1531_v38 = vpop.eup %1530 }
 0x6cb   :  { %v915_v19 = vmul.f32 %v1531_v38, %v1527_v52  ;;  %v910_v49 = vpop.f32.mrf.mxu1  ;;  %v1481_v52 = vld [vmem:[%s2232_s19 + $0x8] sm:$0xff] }
 0x6cc   :  { %1532 = vrcp.f32 %v910_v49  ;;  %934 = vmatpush.bf16.msrb.mxu0 %v828_v59  ;;  %1113 = vmatpush.bf16.msrb.mxu2 %v1481_v52 }
 0x6cd   :  { %1422 = vst.msk [vmem:[%s2227_s24 + $0x10] sm:$0xff] %vm625_vm15, %v915_v19 }
 0x6d0   :  { %1114 = vmatpush.bf16.msrb.mxu2 %v1480_v41 }
 0x6d2   :  { %v1533_v50 = vpop.eup %1532 }
 0x6d3   :  { %v916_v23 = vmul.f32 %v1533_v50, %v1529_v55 }
 0x6d5   :  { %1423 = vst.msk [vmem:[%s2227_s24 + $0x18] sm:$0x1] %vm627_vm0, %v916_v23  ;;  %v920_v24 = vpack.c.bf16 %v916_v23, %v915_v19 }
 0x6d7   :  { %1424 = vmatmul.msk.bf16.vlgmr.msrb.gmra.mxu0 %vm625_vm15, %v920_v24  ;;  %v1498_v24 = vld [vmem:[%s2230_s17] ss:$0 sm:$0xff] }
 0x754   :  { %v936_v62 = vpop.f32.mrf.mxu0 }
 0x755   :  { %v944_v2 = vrot.slane %v936_v62, 7 }
 0x757   :  { %v949_v63 = vsel %vm943_vm3, %v713_v56, %v944_v2 }
 0x758   :  { %v950_v0 = vpack.c.bf16 %v949_v63, %v711_v7 }
 0x75a   :  { %1433 = vmatmul.msk.bf16.vlgmr.msrb.gmra.mxu1 %vm216_vm12, %v950_v0  ;;  %v1499_v0 = vld [vmem:[%s2231_s18] ss:$0 sm:$0xff] }
 0x75c   :  { %v938_v3 = vpop.f32.mrf.mxu0 }
 0x75d   :  { %v945_v44 = vrot.slane %v938_v3, 7 }
 0x75f   :  { %v946_v1 = vsel %vm943_vm3, %v944_v2, %v945_v44 }
 0x760   :  { %v951_v5 = vpack.c.bf16 %v946_v1, %v946_v1 }
 0x76a   :  { %1434 = vmatmul.msk.bf16.gmra.mxu1 %vm216_vm12, %v951_v5 }
 0x7d7   :  { %v987_v4 = vpop.f32.mrf.mxu1 }
 0x7d8   :  { %v988_v9 = vadd.f32 %v1497_v39, %v987_v4 }
 0x7da   :  { %v2104_v10 = vadd.f32 %v988_v9, %v1724_v12 }
 0x7dc   :  { %v1001_v20 = vsel %vm216_vm12, %v2104_v10, 0.0 }
 0x7dd   :  { %1002 = vadd.xlane.f32.xlu1 %v1001_v20 }
 0x7df   :  { %v989_v26 = vpop.f32.mrf.mxu1 }
 0x7e0   :  { %v990_v28 = vadd.f32 %v1497_v39, %v989_v26 }
 0x7e2   :  { %v2109_v47 = vadd.f32 %v990_v28, %v1731_v17 }
 0x7e4   :  { %v1004_v48 = vsel %vm216_vm12, %v2109_v47, 0.0 }
 0x7e5   :  { %1005 = vadd.xlane.f32.xlu2 %v1004_v48 }
 0x7e7   :  { %v992_v53 = vpop.f32.mrf.mxu1 }
 0x7e8   :  { %v993_v45 = vadd.f32 %v1497_v39, %v992_v53 }
 0x7ea   :  { %v2114_v54 = vadd.f32 %v993_v45, %v1738_v22 }
 0x7ec   :  { %v1007_v12 = vsel %vm223_vm13, %v2114_v54, 0.0 }
 0x7ed   :  { %1008 = vadd.xlane.f32.xlu0 %v1007_v12 }
 0x7ef   :  { %v994_v46 = vpop.f32.mrf.mxu1 }
 0x7f0   :  { %v1500_v46 = vld [vmem:[%s2233_s20] ss:$0 sm:$0xff] }
 0x850   :  { %v1003_v17 = vpop.xlane.xlu1 %1002 }
 0x851   :  { %v1010_v55 = vmul.f32 %v1003_v17, %v1742_v31 }
 0x853   :  { %v1013_v6 = vsub.f32 %v2104_v10, %v1010_v55 }
 0x855   :  { %v1016_v7 = vmul.f32 %v1013_v6, %v1013_v6 }
 0x857   :  { %v1019_v56 = vsel %vm216_vm12, %v1016_v7, 0.0 }
 0x858   :  { %v1006_v22 = vpop.xlane.xlu2 %1005  ;;  %1020 = vadd.xlane.f32.xlu1 %v1019_v56 }
 0x859   :  { %v1011_v57 = vmul.f32 %v1006_v22, %v1742_v31 }
 0x85b   :  { %v1014_v8 = vsub.f32 %v2109_v47, %v1011_v57 }
 0x85d   :  { %v1017_v58 = vmul.f32 %v1014_v8, %v1014_v8 }
 0x85f   :  { %v1022_v11 = vsel %vm216_vm12, %v1017_v58, 0.0 }
 0x860   :  { %1023 = vadd.xlane.f32.xlu2 %v1022_v11  ;;  %v1009_v59 = vpop.xlane.xlu0 %1008 }
 0x861   :  { %v1012_v36 = vmul.f32 %v1009_v59, %v1742_v31 }
 0x863   :  { %v1015_v40 = vsub.f32 %v2114_v54, %v1012_v36 }
 0x865   :  { %v1018_v37 = vmul.f32 %v1015_v40, %v1015_v40 }
 0x867   :  { %v1025_v43 = vsel %vm223_vm13, %v1018_v37, 0.0 }
 0x868   :  { %1026 = vadd.xlane.f32.xlu0 %v1025_v43 }
 0x8cb   :  { %v1021_v27 = vpop.xlane.xlu1 %1020 }
 0x8cc   :  { %v1028_v33 = vmul.f32 %v1021_v27, %v1742_v31 }
 0x8ce   :  { %v1031_v35 = vadd.f32 1e-05, %v1028_v33  ;;  %v1485_v33 = vld [vmem:[%s2235_s21 + $0x18] sm:$0xff] }
 0x8cf   :  { %1294 = vmatpush.bf16.msra.mxu0 %v1485_v33 }
 0x8d0   :  { %1534 = vrsqrt.f32 %v1031_v35  ;;  %vm1040_vm5 = vweird.f32 %v1031_v35 }
 0x8d3   :  { %v1024_v60 = vpop.xlane.xlu2 %1023 }
 0x8d4   :  { %v1029_v61 = vmul.f32 %v1024_v60, %v1742_v31 }
 0x8d6   :  { %v1535_v14 = vpop.eup %1534  ;;  %v1032_v15 = vadd.f32 1e-05, %v1029_v61 }
 0x8d7   :  { %v1035_v18 = vmul.f32 %v1535_v14, %v1031_v35  ;;  %vm1041_vm4 = vweird.f32 %v1535_v14 }
 0x8d8   :  { %1536 = vrsqrt.f32 %v1032_v15  ;;  %vm1042_vm6 = vmor %vm1040_vm5, %vm1041_vm4  ;;  %vm1050_vm8 = vweird.f32 %v1032_v15 }
 0x8d9   :  { %v1036_v21 = vmul.f32 %v1535_v14, %v1035_v18  ;;  %v1484_v18 = vld [vmem:[%s2235_s21 + $0x10] sm:$0xff] }
 0x8da   :  { %1295 = vmatpush.bf16.msra.mxu0 %v1484_v18 }
 0x8db   :  { %v1037_v25 = vmul.f32 0.5, %v1036_v21  ;;  %v1027_v29 = vpop.xlane.xlu0 %1026 }
 0x8dc   :  { %v1030_v30 = vmul.f32 %v1027_v29, %v1742_v31 }
 0x8dd   :  { %v1038_v34 = vsub.f32 1.5, %v1037_v25 }
 0x8de   :  { %v1537_v32 = vpop.eup %1536  ;;  %v1033_v13 = vadd.f32 1e-05, %v1030_v30 }
 0x8df   :  { %v1039_v16 = vmul.f32 %v1535_v14, %v1038_v34  ;;  %v1045_v42 = vmul.f32 %v1537_v32, %v1032_v15  ;;  %vm1051_vm7 = vweird.f32 %v1537_v32 }
 0x8e0   :  { %1538 = vrsqrt.f32 %v1033_v13  ;;  %vm1052_vm9 = vmor %vm1050_vm8, %vm1051_vm7  ;;  %vm1060_vm11 = vweird.f32 %v1033_v13 }
 0x8e1   :  { %v1046_v38 = vmul.f32 %v1537_v32, %v1045_v42  ;;  %v1043_v19 = vsel %vm1042_vm6, %v1535_v14, %v1039_v16 }
 0x8e2   :  { %v1064_v31 = vmul.f32 %v1043_v19, %v1013_v6 }
 0x8e3   :  { %v1047_v49 = vmul.f32 0.5, %v1046_v38  ;;  %v1483_v38 = vld [vmem:[%s2235_s21 + $0x8] sm:$0xff] }
 0x8e4   :  { %v1070_v3 = vmul.f32 %v1498_v24, %v1064_v31  ;;  %1296 = vmatpush.bf16.msra.mxu0 %v1483_v38 }
 0x8e5   :  { %v1048_v50 = vsub.f32 1.5, %v1047_v49 }
 0x8e6   :  { %v1539_v23 = vpop.eup %1538  ;;  %v1076_v4 = vadd.f32 %v1499_v0, %v1070_v3 }
 0x8e7   :  { %v1049_v51 = vmul.f32 %v1537_v32, %v1048_v50  ;;  %v1055_v62 = vmul.f32 %v1539_v23, %v1033_v13  ;;  %vm1061_vm10 = vweird.f32 %v1539_v23 }
 0x8e8   :  { %vm1062_vm14 = vmor %vm1060_vm11, %vm1061_vm10 }
 0x8e9   :  { %v1053_v2 = vsel %vm1052_vm9, %v1537_v32, %v1049_v51  ;;  %v1056_v63 = vmul.f32 %v1539_v23, %v1055_v62  ;;  %v1482_v62 = vld [vmem:[%s2235_s21] sm:$0xff] }
 0x8ea   :  { %v1065_v44 = vmul.f32 %v1053_v2, %v1014_v8  ;;  %1297 = vmatpush.bf16.msra.mxu0 %v1482_v62 }
 0x8eb   :  { %v1057_v1 = vmul.f32 0.5, %v1056_v63 }
 0x8ec   :  { %v1071_v5 = vmul.f32 %v1498_v24, %v1065_v44 }
 0x8ed   :  { %v1058_v39 = vsub.f32 1.5, %v1057_v1 }
 0x8ee   :  { %v1077_v9 = vadd.f32 %v1499_v0, %v1071_v5 }
 0x8ef   :  { %v1059_v20 = vmul.f32 %v1539_v23, %v1058_v39 }
 0x8f0   :  { %v1079_v26 = vpack.c.bf16 %v1077_v9, %v1076_v4 }
 0x8f1   :  { %v1063_v28 = vsel %vm1062_vm14, %v1539_v23, %v1059_v20 }
 0x8f2   :  { %1443 = vmatmul.msk.bf16.vlgmr.msrb.gmra.mxu2 %vm216_vm12, %v1079_v26  ;;  %v1066_v48 = vmul.f32 %v1063_v28, %v1015_v40 }
 0x8f4   :  { %v1072_v53 = vmul.f32 %v1498_v24, %v1066_v48 }
 0x8f6   :  { %v1078_v45 = vadd.f32 %v1499_v0, %v1072_v53 }
 0x8f8   :  { %v1080_v12 = vpack.c.bf16 %v1078_v45, %v1078_v45 }
 0x902   :  { %1444 = vmatmul.msk.bf16.gmra.mxu2 %vm216_vm12, %v1080_v12 }
 0x975   :  { %v1116_v52 = vpop.f32.mrf.mxu2 }
 0x976   :  { %v2147_v17 = vadd.f32 %v1500_v46, %v1116_v52 }
 0x978   :  { %v2150_v55 = vmul.f32 0.70710677, %v2147_v17 }
 0x97a   :  { %v1137_v6 = vand.u32 2147483647, %v2150_v55  ;;  %vm1131_vm11 = vcmp.ge.f32.partialorder %v2150_v55, 0.0 }
 0x97c   :  { %v1140_v7 = vmul.f32 0.3275911, %v1137_v6  ;;  %v1218_v16 = vsub.f32 0.0, %v1137_v6 }
 0x97d   :  { %v1118_v56 = vpop.f32.mrf.mxu2 }
 0x97e   :  { %v1143_v22 = vadd.f32 1.0, %v1140_v7  ;;  %v2153_v57 = vadd.f32 %v1500_v46, %v1118_v56  ;;  %v1221_v24 = vmul.f32 %v1218_v16, %v1137_v6 }
 0x980   :  { %1540 = vrcp.f32 %v1143_v22  ;;  %v2156_v8 = vmul.f32 0.70710677, %v2153_v57  ;;  %v1157_v41 = vand.u32 2147483648, %v1143_v22  ;;  %v1155_v14 = vand.u32 2147483647, %v1143_v22 }
 0x981   :  { %vm1151_vm0 = vweird.f32 %v1143_v22  ;;  %v1224_v5 = vmul.f32 1.442695, %v1221_v24 }
 0x982   :  { %v2159_v58 = vand.u32 2147483647, %v2156_v8  ;;  %v1158_v29 = vor.u32 1.1754944e-38, %v1157_v41  ;;  %vm1156_vm2 = vcmp.eq.f32.partialorder %v1155_v14, 8.507059e+37  ;;  %vm1132_vm14 = vcmp.ge.f32.partialorder %v2156_v8, 0.0 }
 0x984   :  { %v1141_v11 = vmul.f32 0.3275911, %v2159_v58  ;;  %v1219_v20 = vsub.f32 0.0, %v2159_v58 }
 0x985   :  { %v1121_v59 = vpop.f32.mrf.mxu2 }
 0x986   :  { %v1541_v36 = vpop.eup %1540  ;;  %v2162_v40 = vadd.f32 %v1500_v46, %v1121_v59  ;;  %v1144_v43 = vadd.f32 1.0, %v1141_v11  ;;  %v1222_v6 = vmul.f32 %v1219_v20, %v2159_v58 }
 0x987   :  { %v1147_v37 = vmul.f32 %v1541_v36, %v1143_v22  ;;  %vm1152_vm15 = vweird.f32 %v1541_v36 }
 0x988   :  { %v2165_v27 = vmul.f32 0.70710677, %v2162_v40  ;;  %1542 = vrcp.f32 %v1144_v43  ;;  %vm1153_vm1 = vmor %vm1151_vm0, %vm1152_vm15  ;;  %v1172_v23 = vand.u32 2147483648, %v1144_v43  ;;  %v1170_v51 = vand.u32 2147483647, %v1144_v43 }
 0x989   :  { %v1148_v35 = vsub.f32 1.0, %v1147_v37  ;;  %vm1166_vm4 = vweird.f32 %v1144_v43  ;;  %vm1283_vm15 = vcmask 523264  }
 0x98a   :  { %v2171_v60 = vand.u32 2147483647, %v2165_v27  ;;  %v1173_v44 = vor.u32 1.1754944e-38, %v1172_v23  ;;  %vm1171_vm6 = vcmp.eq.f32.partialorder %v1170_v51, 8.507059e+37  ;;  %vm1133_vm0 = vcmp.ge.f32.partialorder %v2165_v27, 0.0 }
 0x98b   :  { %v1149_v61 = vmul.f32 %v1541_v36, %v1148_v35  ;;  %v1226_v35 = vmul.f32 1.442695, %v1222_v6 }
 0x98c   :  { %v1142_v15 = vmul.f32 0.3275911, %v2171_v60 }
 0x98d   :  { %v1150_v21 = vadd.f32 %v1541_v36, %v1149_v61  ;;  %v1123_v25 = vpop.f32.mrf.mxu2 }
 0x98e   :  { %v1145_v30 = vadd.f32 1.0, %v1142_v15  ;;  %v1543_v34 = vpop.eup %1542 }
 0x98f   :  { %v1154_v32 = vsel %vm1153_vm1, %v1541_v36, %v1150_v21  ;;  %v1162_v42 = vmul.f32 %v1543_v34, %v1144_v43  ;;  %vm1167_vm3 = vweird.f32 %v1543_v34  ;;  %v1220_v43 = vsub.f32 0.0, %v2171_v60 }
 0x990   :  { %v1159_v13 = vsel %vm1156_vm2, %v1158_v29, %v1154_v32  ;;  %1544 = vrcp.f32 %v1145_v30  ;;  %vm1168_vm5 = vmor %vm1166_vm4, %vm1167_vm3  ;;  %v1187_v48 = vand.u32 2147483648, %v1145_v30  ;;  %v1185_v12 = vand.u32 2147483647, %v1145_v30 }
 0x991   :  { %v1191_v19 = vmul.f32 1.0614054, %v1159_v13  ;;  %v1163_v49 = vsub.f32 1.0, %v1162_v42  ;;  %1546 = vpow2.f32 %v1224_v5  ;;  %vm1181_vm8 = vweird.f32 %v1145_v30 }
 0x992   :  { %v1188_v22 = vor.u32 1.1754944e-38, %v1187_v48  ;;  %vm1186_vm10 = vcmp.eq.f32.partialorder %v1185_v12, 8.507059e+37  ;;  %v1223_v21 = vmul.f32 %v1220_v43, %v2171_v60  ;;  %1548 = vpow2.f32 %v1226_v35 }
 0x993   :  { %v1194_v50 = vadd.f32 -1.4531521, %v1191_v19  ;;  %v1164_v31 = vmul.f32 %v1543_v34, %v1163_v49  ;;  %v1556_v19 = vmov -1.0   ;;  %v1127_v48 = vmul.f32 0.5, %v2162_v40 }
 0x994   :  { %v1228_v16 = vmul.f32 1.442695, %v1223_v21  ;;  %v1134_v49 = vsel %vm1131_vm11, 1.0, %v1556_v19  ;;  %v1135_v51 = vsel %vm1132_vm14, 1.0, %v1556_v19  ;;  %v1136_v20 = vsel %vm1133_vm0, 1.0, %v1556_v19 }
 0x995   :  { %v1197_v2 = vmul.f32 %v1194_v50, %v1159_v13  ;;  %v1165_v0 = vadd.f32 %v1543_v34, %v1164_v31 }
 0x996   :  { %v1545_v63 = vpop.eup %1544  ;;  %1550 = vpow2.f32 %v1228_v16 }
 0x997   :  { %v1200_v3 = vadd.f32 1.4214138, %v1197_v2  ;;  %v1177_v1 = vmul.f32 %v1545_v63, %v1145_v30  ;;  %v1169_v39 = vsel %vm1168_vm5, %v1543_v34, %v1165_v0  ;;  %vm1182_vm7 = vweird.f32 %v1545_v63  ;;  %v1547_v61 = vpop.eup %1546 }
 0x998   :  { %v1174_v9 = vsel %vm1171_vm6, %v1173_v44, %v1169_v39  ;;  %vm1183_vm9 = vmor %vm1181_vm8, %vm1182_vm7  ;;  %v1549_v38 = vpop.eup %1548  ;;  %v1126_v44 = vmul.f32 0.5, %v2153_v57 }
 0x999   :  { %v1203_v4 = vmul.f32 %v1200_v3, %v1159_v13  ;;  %v1178_v26 = vsub.f32 1.0, %v1177_v1  ;;  %v1192_v28 = vmul.f32 1.0614054, %v1174_v9  ;;  %v1125_v3 = vmul.f32 0.5, %v2147_v17  ;;  %v1501_v17 = vld [vmem:[%s2234_s22] ss:$0 sm:$0xff] }
 0x99b   :  { %v1206_v53 = vadd.f32 -0.28449672, %v1203_v4  ;;  %v1179_v45 = vmul.f32 %v1545_v63, %v1178_v26  ;;  %v1195_v46 = vadd.f32 -1.4531521, %v1192_v28 }
 0x99c   :  { %v1551_v0 = vpop.eup %1550 }
 0x99d   :  { %v1209_v52 = vmul.f32 %v1206_v53, %v1159_v13  ;;  %v1180_v7 = vadd.f32 %v1545_v63, %v1179_v45  ;;  %v1198_v56 = vmul.f32 %v1195_v46, %v1174_v9 }
 0x99f   :  { %v1212_v11 = vadd.f32 0.2548296, %v1209_v52  ;;  %v1184_v59 = vsel %vm1183_vm9, %v1545_v63, %v1180_v7  ;;  %v1201_v36 = vadd.f32 1.4214138, %v1198_v56 }
 0x9a0   :  { %v1189_v37 = vsel %vm1186_vm10, %v1188_v22, %v1184_v59 }
 0x9a1   :  { %v1215_v33 = vmul.f32 %v1212_v11, %v1159_v13  ;;  %v1193_v41 = vmul.f32 1.0614054, %v1189_v37  ;;  %v1204_v14 = vmul.f32 %v1201_v36, %v1174_v9 }
 0x9a3   :  { %v1196_v15 = vadd.f32 -1.4531521, %v1193_v41  ;;  %v1230_v18 = vmul.f32 %v1547_v61, %v1215_v33  ;;  %v1207_v58 = vadd.f32 -0.28449672, %v1204_v14 }
 0x9a5   :  { %v1199_v25 = vmul.f32 %v1196_v15, %v1189_v37  ;;  %v1210_v29 = vmul.f32 %v1207_v58, %v1174_v9  ;;  %v1233_v34 = vsub.f32 1.0, %v1230_v18 }
 0x9a7   :  { %v1202_v30 = vadd.f32 1.4214138, %v1199_v25  ;;  %v1213_v32 = vadd.f32 0.2548296, %v1210_v29  ;;  %v1236_v23 = vmul.f32 %v1233_v34, %v1134_v49 }
 0x9a9   :  { %v1205_v42 = vmul.f32 %v1202_v30, %v1189_v37  ;;  %v1216_v13 = vmul.f32 %v1213_v32, %v1174_v9  ;;  %v1239_v2 = vadd.f32 1.0, %v1236_v23 }
 0x9ab   :  { %v1208_v50 = vadd.f32 -0.28449672, %v1205_v42  ;;  %v1231_v24 = vmul.f32 %v1549_v38, %v1216_v13  ;;  %v1242_v39 = vmul.f32 %v1239_v2, %v1125_v3 }
 0x9ad   :  { %v1211_v60 = vmul.f32 %v1208_v50, %v1189_v37  ;;  %v1234_v31 = vsub.f32 1.0, %v1231_v24 }
 0x9af   :  { %v1214_v62 = vadd.f32 0.2548296, %v1211_v60  ;;  %v1237_v55 = vmul.f32 %v1234_v31, %v1135_v51 }
 0x9b1   :  { %v1217_v63 = vmul.f32 %v1214_v62, %v1189_v37  ;;  %v1240_v1 = vadd.f32 1.0, %v1237_v55 }
 0x9b3   :  { %v1232_v5 = vmul.f32 %v1551_v0, %v1217_v63  ;;  %v1243_v4 = vmul.f32 %v1240_v1, %v1126_v44 }
 0x9b5   :  { %v1245_v8 = vpack.c.bf16 %v1243_v4, %v1242_v39  ;;  %v1235_v9 = vsub.f32 1.0, %v1232_v5 }
 0x9b7   :  { %1461 = vmatmul.msk.bf16.vlgmr.msra.gmra.mxu0 %vm1283_vm15, %v1245_v8  ;;  %v1238_v26 = vmul.f32 %v1235_v9, %v1136_v20 }
 0x9b9   :  { %v1241_v28 = vadd.f32 1.0, %v1238_v26 }
 0x9bb   :  { %v1244_v53 = vmul.f32 %v1241_v28, %v1127_v48 }
 0x9bd   :  { %v1246_v45 = vpack.c.bf16 %v1244_v53, %v1244_v53 }
 0x9c7   :  { %1462 = vmatmul.msk.bf16.gmra.mxu0 %vm1283_vm15, %v1246_v45 }
 0xa34   :  { %v1299_v57 = vpop.f32.mrf.mxu0 }
 0xa35   :  { %v1300_v12 = vadd.f32 %v1501_v17, %v1299_v57 }
 0xa37   :  { %v1308_v46 = vadd.f32 %v1300_v12, %v2104_v10 }
 0xa39   :  { %1311 = vst.msk [vmem:[%s2236_s23] sm:$0xff] %vm216_vm12, %v1308_v46 }
 0xa3c   :  { %v1301_v27 = vpop.f32.mrf.mxu0 }
 0xa3d   :  { %v1302_v52 = vadd.f32 %v1501_v17, %v1301_v27 }
 0xa3f   :  { %v1309_v40 = vadd.f32 %v1302_v52, %v2109_v47 }
 0xa41   :  { %1312 = vst.msk [vmem:[%s2236_s23 + $0x8] sm:$0xff] %vm216_vm12, %v1309_v40 }
 0xa44   :  { %v1304_v6 = vpop.f32.mrf.mxu0 }
 0xa45   :  { %v1305_v7 = vadd.f32 %v1501_v17, %v1304_v6 }
 0xa47   :  { %v1310_v56 = vadd.f32 %v1305_v7, %v2114_v54 }
 0xa49   :  { %1313 = vst.msk [vmem:[%s2236_s23 + $0x10] sm:$0x3] %vm223_vm13, %v1310_v56 }
 0xa4c   :  { %v1306_v10 = vpop.f32.mrf.mxu0 }

</bundles_post_ra>
